<compile_context>
chip_gen: v5e
topology: v5e:2x2
jax: 0.10.0
libtpu: 0.0.40
codegen_flags: <defaults>
</compile_context>

<pallas_src>
import functools

import jax
import jax.numpy as jnp
from jax.experimental import pallas as pl
from jax.experimental.pallas import tpu as pltpu

IMG_DIM = 28 * 28   # 784
HIDDEN = 128


def _decoder_kernel(q_ref, w1_ref, b1_ref, w2_ref, b2_ref, w3_ref, b3_ref,
                    *out_refs, q_dim, extra, split_image):
    """image = Tanh(ReLU(ReLU(q_ W1 + b1) W2 + b2) W3 + b3); q_dot passthrough."""
    q = q_ref[...]                                        # (TB, q_dim + extra) f32
    x = q[:, :q_dim]                                      # f32; K = q_dim is tiny, layer-1 cost ~0

    h1 = jnp.dot(x, w1_ref[...], preferred_element_type=jnp.float32)
    h1 = jnp.maximum(h1 + b1_ref[...], 0.0)               # (TB, 128) f32, ReLU

    h2 = jnp.dot(h1.astype(jnp.bfloat16), w2_ref[...],
                 preferred_element_type=jnp.float32)
    h2 = jnp.maximum(h2 + b2_ref[...], 0.0)               # (TB, 128) f32, ReLU

    y = jnp.dot(h2.astype(jnp.bfloat16), w3_ref[...],
                preferred_element_type=jnp.float32)       # (TB, 784) f32
    img = jnp.tanh(y + b3_ref[...])

    if split_image:
        out_refs[0][...] = img.astype(out_refs[0].dtype)  # bf16 image -> half the HBM writeback
        if extra > 0:
            out_refs[1][...] = q[:, q_dim:]               # exact f32 q_dot
    else:
        out_ref = out_refs[0]
        if extra > 0:
            out_ref[:, :IMG_DIM] = img
            out_ref[:, IMG_DIM:] = q[:, q_dim:]           # fused torch.cat passthrough (exact f32)
        else:
            out_ref[...] = img


def _round_up(x, m):
    return (x + m - 1) // m * m


def _choose_tiling(batch, block_b):
    """Pick (tb, padded_b).

    tb is a multiple of 8 (full sublanes), capped at min(block_b, 2048) per the
    v7x VMEM guard.  Keep >= 2 grid tiles whenever the batch allows it (v7x has
    2 TensorCores and >= 2 steps let output DMA overlap compute); prefer >= 4
    tiles when that still leaves >= 512-row tiles.
    """
    block_b = max(8, _round_up(min(block_b, 2048), 8))
    desired_tiles = 4 if batch >= 4 * 512 else 2
    tb = min(block_b, max(8, _round_up(pl.cdiv(batch, desired_tiles), 8)))
    padded_b = _round_up(batch, tb)
    return tb, padded_b


def _vmem_limit_bytes(tb, q_total, out_tile_bytes):
    """Explicit scoped-VMEM limit when the footprint may exceed v5e's 16 MiB
    default (v6e/v7x default is 32 MiB).  Returns None to keep compiler default."""
    est = (2 * tb * q_total * 4              # double-buffered q tiles
           + 2 * out_tile_bytes              # double-buffered output tiles
           + tb * (IMG_DIM + 4 * HIDDEN) * 4  # f32 intermediates
           + (1 << 20))                      # resident weights/biases + slack
    if est <= (12 << 20):
        return None
    return min(2 * est, 48 << 20)            # stays well under v7x's 64 MiB physical per TC


def decoder_image_forward(q, params, q_dim, *, block_b=1024, image_dtype=jnp.float32):
    """JAX/Pallas equivalent of DecoderImage.forward.

    q: (B, q_dim + extra).
    image_dtype=jnp.float32 (default): returns (B, 784 + extra) float32 —
        exact module semantics (f32 image concat exact-f32 q_dot, fused in-kernel).
    image_dtype=jnp.bfloat16: returns (image_bf16 (B, 784), q_dot_f32 (B, extra))
        as two arrays — halves the bound HBM writeback for consumers that
        tolerate a bf16 image (tanh output in [-1, 1]).
    """
    q = q.astype(jnp.float32)
    batch, q_total = q.shape
    extra = q_total - q_dim
    w1, b1, w2, b2, w3, b3 = params
    split_image = jnp.dtype(image_dtype) != jnp.dtype(jnp.float32)

    tb, padded_b = _choose_tiling(batch, block_b)
    q_in = q if padded_b == batch else jnp.pad(q, ((0, padded_b - batch), (0, 0)))
    grid = (padded_b // tb,)

    const = lambda i: (0, 0)   # weights/biases: single resident VMEM copy across the grid
    row = lambda i: (i, 0)     # batch-blocked tiles

    in_specs = [
        pl.BlockSpec((tb, q_total), row),        # q tile
        pl.BlockSpec((q_dim, HIDDEN), const),    # w1 (f32)
        pl.BlockSpec((1, HIDDEN), const),        # b1 (f32)
        pl.BlockSpec((HIDDEN, HIDDEN), const),   # w2 (bf16)
        pl.BlockSpec((1, HIDDEN), const),        # b2 (f32)
        pl.BlockSpec((HIDDEN, IMG_DIM), const),  # w3 (bf16)
        pl.BlockSpec((1, IMG_DIM), const),       # b3 (f32)
    ]

    if split_image:
        out_shape = [jax.ShapeDtypeStruct((padded_b, IMG_DIM), image_dtype)]
        out_specs = [pl.BlockSpec((tb, IMG_DIM), row)]
        out_tile_bytes = tb * IMG_DIM * jnp.dtype(image_dtype).itemsize
        if extra > 0:
            out_shape.append(jax.ShapeDtypeStruct((padded_b, extra), jnp.float32))
            out_specs.append(pl.BlockSpec((tb, extra), row))
            out_tile_bytes += tb * extra * 4
        out_shape = tuple(out_shape)
    else:
        out_dim = IMG_DIM + extra
        out_shape = jax.ShapeDtypeStruct((padded_b, out_dim), jnp.float32)
        out_specs = pl.BlockSpec((tb, out_dim), row)
        out_tile_bytes = tb * out_dim * 4

    kernel = functools.partial(_decoder_kernel, q_dim=q_dim, extra=extra,
                               split_image=split_image)

    outs = pl.pallas_call(
        kernel,
        out_shape=out_shape,
        grid_spec=pltpu.PrefetchScalarGridSpec(
            num_scalar_prefetch=0,
            grid=grid,
            in_specs=in_specs,
            out_specs=out_specs,
        ),
        compiler_params=pltpu.CompilerParams(
            dimension_semantics=("parallel",),   # shard batch tiles across v7x's 2 TCs
            vmem_limit_bytes=_vmem_limit_bytes(tb, q_total, out_tile_bytes),
        ),
    )(q_in, w1, b1, w2, b2, w3, b3)

    if split_image:
        outs = list(outs) if isinstance(outs, (tuple, list)) else [outs]
        if padded_b != batch:
            outs = [o[:batch] for o in outs]
        if extra > 0:
            return outs[0], outs[1]
        return outs[0], jnp.zeros((batch, 0), jnp.float32)

    return outs[:batch] if padded_b != batch else outs


def init_params(key, q_dim):
    """Init mirroring nn.Linear's U(-1/sqrt(fan_in), 1/sqrt(fan_in)).

    Weights stored transposed vs PyTorch ((in, out)).  w1 stays f32 (K=q_dim is
    tiny, exact layer 1 is free); w2/w3 are bf16 (MXU-native).  Biases are
    (1, out) f32 for in-kernel sublane broadcast.
    """
    ks = jax.random.split(key, 6)

    def lin(kw, kb, fan_in, fan_out, w_dtype):
        bound = 1.0 / (fan_in ** 0.5)
        w = jax.random.uniform(kw, (fan_in, fan_out), jnp.float32, -bound, bound)
        b = jax.random.uniform(kb, (1, fan_out), jnp.float32, -bound, bound)
        return w.astype(w_dtype), b

    w1, b1 = lin(ks[0], ks[1], q_dim, HIDDEN, jnp.float32)
    w2, b2 = lin(ks[2], ks[3], HIDDEN, HIDDEN, jnp.bfloat16)
    w3, b3 = lin(ks[4], ks[5], HIDDEN, IMG_DIM, jnp.bfloat16)
    return (w1, b1, w2, b2, w3, b3)


def _reference_kernel_numerics(q, params, q_dim):
    """Pure-JAX reference matching the kernel's numerics (f32 layer 1, bf16 MXU
    operands + f32 accumulation for layers 2/3).  Returns (image, q_dot)."""
    q = q.astype(jnp.float32)
    q_, q_dot = q[:, :q_dim], q[:, q_dim:]
    w1, b1, w2, b2, w3, b3 = params
    h = jnp.maximum(jnp.dot(q_, w1, preferred_element_type=jnp.float32) + b1, 0.0)
    h = jnp.maximum(jnp.dot(h.astype(jnp.bfloat16), w2,
                            preferred_element_type=jnp.float32) + b2, 0.0)
    img = jnp.tanh(jnp.dot(h.astype(jnp.bfloat16), w3,
                           preferred_element_type=jnp.float32) + b3)
    return img, q_dot


def _reference_f32(q, params, q_dim):
    """Full-f32 reference (original PyTorch semantics) for a loose sanity check."""
    q = q.astype(jnp.float32)
    q_, q_dot = q[:, :q_dim], q[:, q_dim:]
    w1, b1, w2, b2, w3, b3 = params
    h = jnp.maximum(q_ @ w1.astype(jnp.float32) + b1, 0.0)
    h = jnp.maximum(h @ w2.astype(jnp.float32) + b2, 0.0)
    img = jnp.tanh(h @ w3.astype(jnp.float32) + b3)
    return jnp.concatenate([img, q_dot], axis=1)


if __name__ == "__main__":
    key = jax.random.PRNGKey(0)
    q_dim = 8       # generalized coordinates
    extra = 8       # q_dot (velocities), passed through untouched
    batch = 500     # not a multiple of 8: exercises padding; grid=(2,) at TB=256

    k_param, k_data = jax.random.split(key)
    params = init_params(k_param, q_dim)
    q = jax.random.normal(k_data, (batch, q_dim + extra), jnp.float32)

    # --- default mode: exact module semantics, single fused f32 output --------
    out = jax.block_until_ready(decoder_image_forward(q, params, q_dim))
    assert out.shape == (batch, IMG_DIM + extra), out.shape
    assert out.dtype == jnp.float32

    ref_img, ref_qdot = _reference_kernel_numerics(q, params, q_dim)
    ref_fused = jnp.concatenate([ref_img, ref_qdot], axis=1)
    ref_f32 = _reference_f32(q, params, q_dim)

    # Tight check vs the reference that matches the kernel's numerics.
    assert jnp.allclose(out, ref_fused, atol=2e-3, rtol=2e-3), \
        float(jnp.max(jnp.abs(out - ref_fused)))
    # Loose check vs the full-f32 PyTorch-equivalent reference (bf16 w2/w3 slack).
    assert jnp.allclose(out, ref_f32, atol=1e-1, rtol=0.0), \
        float(jnp.max(jnp.abs(out - ref_f32)))
    # q_dot passthrough must be exact.
    assert jnp.array_equal(out[:, IMG_DIM:], q[:, q_dim:])

    # --- bandwidth-optimal mode: bf16 image + exact f32 q_dot as two outputs ---
    img_bf16, q_dot = decoder_image_forward(q, params, q_dim,
                                            image_dtype=jnp.bfloat16)
    img_bf16 = jax.block_until_ready(img_bf16)
    q_dot = jax.block_until_ready(q_dot)
    assert img_bf16.shape == (batch, IMG_DIM) and img_bf16.dtype == jnp.bfloat16
    assert q_dot.shape == (batch, extra) and q_dot.dtype == jnp.float32
    assert jnp.allclose(img_bf16.astype(jnp.float32), ref_img, atol=1e-2, rtol=0.0), \
        float(jnp.max(jnp.abs(img_bf16.astype(jnp.float32) - ref_img)))
    assert jnp.array_equal(q_dot, q[:, q_dim:])

    print("KERNEL_OK")
</pallas_src>

<mosaic_0001>
module attributes {stable_mosaic.version = 11 : i64} {
  func.func @_decoder_kernel(%arg0: i32, %arg1: memref<256x16xf32, #tpu.memory_space<vmem>>, %arg2: memref<8x128xf32, #tpu.memory_space<vmem>>, %arg3: memref<1x128xf32, #tpu.memory_space<vmem>>, %arg4: memref<128x128xbf16, #tpu.memory_space<vmem>>, %arg5: memref<1x128xf32, #tpu.memory_space<vmem>>, %arg6: memref<128x784xbf16, #tpu.memory_space<vmem>>, %arg7: memref<1x784xf32, #tpu.memory_space<vmem>>, %arg8: memref<256x792xf32, #tpu.memory_space<vmem>>) attributes {dimension_semantics = [#tpu.dimension_semantics<parallel>], iteration_bounds = array<i64: 2>, scalar_prefetch = 0 : i64, scratch_operands = 0 : i64, tpu.core_type = #tpu.core_type<tc>, window_params = [{transform_indices = @transform_0, window_bounds = array<i64: 256, 16>}, {pipeline_mode = #tpu.pipeline_mode<synchronous>, transform_indices = @transform_1, window_bounds = array<i64: 8, 128>}, {pipeline_mode = #tpu.pipeline_mode<synchronous>, transform_indices = @transform_2, window_bounds = array<i64: 1, 128>}, {pipeline_mode = #tpu.pipeline_mode<synchronous>, transform_indices = @transform_3, window_bounds = array<i64: 128, 128>}, {pipeline_mode = #tpu.pipeline_mode<synchronous>, transform_indices = @transform_4, window_bounds = array<i64: 1, 128>}, {pipeline_mode = #tpu.pipeline_mode<synchronous>, transform_indices = @transform_5, window_bounds = array<i64: 128, 784>}, {pipeline_mode = #tpu.pipeline_mode<synchronous>, transform_indices = @transform_6, window_bounds = array<i64: 1, 784>}, {transform_indices = @transform_7, window_bounds = array<i64: 256, 792>}]} {
    %c0 = arith.constant 0 : index
    %c0_0 = arith.constant 0 : index
    %0 = vector.load %arg1[%c0, %c0_0] : memref<256x16xf32, #tpu.memory_space<vmem>>, vector<256x16xf32>
    %1 = vector.extract_strided_slice %0 {offsets = [0, 0], sizes = [256, 8], strides = [1, 1]} : vector<256x16xf32> to vector<256x8xf32>
    %c0_1 = arith.constant 0 : index
    %c0_2 = arith.constant 0 : index
    %2 = vector.load %arg2[%c0_1, %c0_2] : memref<8x128xf32, #tpu.memory_space<vmem>>, vector<8x128xf32>
    %cst = arith.constant dense<0.000000e+00> : vector<256x128xf32>
    %3 = tpu.matmul %1, %2, %cst {dimension_numbers = #tpu.dot_dimension_numbers<[1], [0], [0], [1], [0, 0, 1, 1], [], []>} : vector<256x8xf32>, vector<8x128xf32>, vector<256x128xf32> -> vector<256x128xf32>
    %c0_3 = arith.constant 0 : index
    %c0_4 = arith.constant 0 : index
    %4 = vector.load %arg3[%c0_3, %c0_4] : memref<1x128xf32, #tpu.memory_space<vmem>>, vector<1x128xf32>
    %5 = vector.broadcast %4 : vector<1x128xf32> to vector<256x128xf32>
    %6 = arith.addf %3, %5 : vector<256x128xf32>
    %cst_5 = arith.constant 0.000000e+00 : f32
    %7 = vector.broadcast %cst_5 : f32 to vector<256x128xf32>
    %8 = arith.maximumf %6, %7 : vector<256x128xf32>
    %9 = arith.truncf %8 : vector<256x128xf32> to vector<256x128xbf16>
    %c0_6 = arith.constant 0 : index
    %c0_7 = arith.constant 0 : index
    %10 = vector.load %arg4[%c0_6, %c0_7] : memref<128x128xbf16, #tpu.memory_space<vmem>>, vector<128x128xbf16>
    %cst_8 = arith.constant dense<0.000000e+00> : vector<256x128xf32>
    %11 = tpu.matmul %9, %10, %cst_8 {dimension_numbers = #tpu.dot_dimension_numbers<[1], [0], [0], [1], [0, 0, 1, 1], [], []>} : vector<256x128xbf16>, vector<128x128xbf16>, vector<256x128xf32> -> vector<256x128xf32>
    %c0_9 = arith.constant 0 : index
    %c0_10 = arith.constant 0 : index
    %12 = vector.load %arg5[%c0_9, %c0_10] : memref<1x128xf32, #tpu.memory_space<vmem>>, vector<1x128xf32>
    %13 = vector.broadcast %12 : vector<1x128xf32> to vector<256x128xf32>
    %14 = arith.addf %11, %13 : vector<256x128xf32>
    %cst_11 = arith.constant 0.000000e+00 : f32
    %15 = vector.broadcast %cst_11 : f32 to vector<256x128xf32>
    %16 = arith.maximumf %14, %15 : vector<256x128xf32>
    %17 = arith.truncf %16 : vector<256x128xf32> to vector<256x128xbf16>
    %c0_12 = arith.constant 0 : index
    %c0_13 = arith.constant 0 : index
    %18 = vector.load %arg6[%c0_12, %c0_13] : memref<128x784xbf16, #tpu.memory_space<vmem>>, vector<128x784xbf16>
    %cst_14 = arith.constant dense<0.000000e+00> : vector<256x784xf32>
    %19 = tpu.matmul %17, %18, %cst_14 {dimension_numbers = #tpu.dot_dimension_numbers<[1], [0], [0], [1], [0, 0, 1, 1], [], []>} : vector<256x128xbf16>, vector<128x784xbf16>, vector<256x784xf32> -> vector<256x784xf32>
    %c0_15 = arith.constant 0 : index
    %c0_16 = arith.constant 0 : index
    %20 = vector.load %arg7[%c0_15, %c0_16] : memref<1x784xf32, #tpu.memory_space<vmem>>, vector<1x784xf32>
    %21 = vector.broadcast %20 : vector<1x784xf32> to vector<256x784xf32>
    %22 = arith.addf %19, %21 : vector<256x784xf32>
    %23 = math.tanh %22 : vector<256x784xf32>
    %c0_17 = arith.constant 0 : index
    %c0_18 = arith.constant 0 : index
    %24 = vector.load %arg8[%c0_17, %c0_18] : memref<256x792xf32, #tpu.memory_space<vmem>>, vector<256x784xf32>
    tpu.vector_store %arg8[%c0_17, %c0_18], %23 {strides = array<i32>} : memref<256x792xf32, #tpu.memory_space<vmem>>, vector<256x784xf32>,
    %25 = vector.extract_strided_slice %0 {offsets = [0, 8], sizes = [256, 8], strides = [1, 1]} : vector<256x16xf32> to vector<256x8xf32>
    %c0_19 = arith.constant 0 : index
    %c784 = arith.constant 784 : index
    %26 = vector.load %arg8[%c0_19, %c784] : memref<256x792xf32, #tpu.memory_space<vmem>>, vector<256x8xf32>
    tpu.vector_store %arg8[%c0_19, %c784], %25 {strides = array<i32>} : memref<256x792xf32, #tpu.memory_space<vmem>>, vector<256x8xf32>,
    return
  }
  func.func @transform_0(%arg0: i32) -> (i32, i32) {
    %c0_i32 = arith.constant 0 : i32
    %c0_i32_0 = arith.constant 0 : i32
    return %arg0, %c0_i32 : i32, i32
  }
  func.func @transform_1(%arg0: i32) -> (i32, i32) {
    %c0_i32 = arith.constant 0 : i32
    %c0_i32_0 = arith.constant 0 : i32
    %c0_i32_1 = arith.constant 0 : i32
    return %c0_i32, %c0_i32_0 : i32, i32
  }
  func.func @transform_2(%arg0: i32) -> (i32, i32) {
    %c0_i32 = arith.constant 0 : i32
    %c0_i32_0 = arith.constant 0 : i32
    %c0_i32_1 = arith.constant 0 : i32
    return %c0_i32, %c0_i32_0 : i32, i32
  }
  func.func @transform_3(%arg0: i32) -> (i32, i32) {
    %c0_i32 = arith.constant 0 : i32
    %c0_i32_0 = arith.constant 0 : i32
    %c0_i32_1 = arith.constant 0 : i32
    return %c0_i32, %c0_i32_0 : i32, i32
  }
  func.func @transform_4(%arg0: i32) -> (i32, i32) {
    %c0_i32 = arith.constant 0 : i32
    %c0_i32_0 = arith.constant 0 : i32
    %c0_i32_1 = arith.constant 0 : i32
    return %c0_i32, %c0_i32_0 : i32, i32
  }
  func.func @transform_5(%arg0: i32) -> (i32, i32) {
    %c0_i32 = arith.constant 0 : i32
    %c0_i32_0 = arith.constant 0 : i32
    %c0_i32_1 = arith.constant 0 : i32
    return %c0_i32, %c0_i32_0 : i32, i32
  }
  func.func @transform_6(%arg0: i32) -> (i32, i32) {
    %c0_i32 = arith.constant 0 : i32
    %c0_i32_0 = arith.constant 0 : i32
    %c0_i32_1 = arith.constant 0 : i32
    return %c0_i32, %c0_i32_0 : i32, i32
  }
  func.func @transform_7(%arg0: i32) -> (i32, i32) {
    %c0_i32 = arith.constant 0 : i32
    %c0_i32_0 = arith.constant 0 : i32
    return %arg0, %c0_i32 : i32, i32
  }
}

</mosaic_0001>

<bundles_post_ra>
// kernel: tpu_custom_call.1
= control target key start
LH: loop header
LB: loop body
LE: loop exit
PB: predicated region body
PF: predicated region fallthrough
CT: control target
= control target key end

     0   :  { %12 = vsyncpa [#allocation3], 0  ;;  %s5035_s0 = inlined_call_operand.vmem [shape: f32[512,16], index: 0, kind: input, shape index: {}]   ;;  %s5036_s1 = inlined_call_operand.hbm [shape: f32[8,128], index: 1, kind: input, shape index: {}]   ;;  %s5037_s2 = inlined_call_operand.hbm [shape: f32[1,128], index: 2, kind: input, shape index: {}]   ;;  %s5038_s3 = inlined_call_operand.hbm [shape: bf16[128,128], index: 3, kind: input, shape index: {}]   ;;  %s5039_s4 = inlined_call_operand.hbm [shape: f32[1,128], index: 4, kind: input, shape index: {}]   ;;  %s5040_s5 = inlined_call_operand.vmem [shape: bf16[128,784], index: 5, kind: input, shape index: {}]   ;;  %s5041_s6 = inlined_call_operand.hbm [shape: f32[1,784], index: 6, kind: input, shape index: {}]   ;;  %s5042_s7 = inlined_call_operand.vmem [shape: f32[512,792], index: 7, kind: output, shape index: {}]  }
   0x1   :  { %13 = vsyncpa [#allocation5], 0 }
   0x2   :  { %14 = vsyncpa [#allocation8], 0  ;;  %s3685_s24 = smov 0  }
   0x3 LB: > { %s227_s27 = sshll.u32 %s5037_s2, 4  ;;  %s2536_s28 = sadd.s32 4294967295, %s3635_s24   ;;  %s3635_s24 = sphi %s3685_s24, %s20_s24   ;;  %s228_s27 = int_to_ptr.hbm [resolvable:$true] %s227_s27 }
   0x4   : > { %p2538_p0 = scmp.ge.s32.totalorder %s3635_s24, 1  ;;  %p203_p1 = scmp.lt.s32.totalorder %s3635_s24, 3 }
   0x5   : > { %p3698_p2 = scmp.eq.s32.totalorder %s2536_s28, 0  ;;  %s3637_s8 = smov [#allocation4]  }
   0x6   : > { %p3702_p3 = pnand %p2538_p0, %p203_p1  ;;  %s229_s9 = sshll.u32 %s3637_s8, 4  ;;  %s230_s9 = int_to_ptr.vmem [resolvable:$true] %s229_s9 }
   0x7   : > { %s253_s12 = sshll.u32 %s5039_s4, 4  ;;  %s215_s15 = sshll.u32 %s5036_s1, 4  ;;  %s254_s12 = int_to_ptr.hbm [resolvable:$true] %s253_s12  ;;  %s216_s15 = int_to_ptr.hbm [resolvable:$true] %s215_s15 }
   0x8   : > { %p2941_p4 = pneg %p3702_p3  ;;  %s3638_s17 = smov [#allocation7]  }
   0x9   : > { %s255_s18 = sshll.u32 %s3638_s17, 4  ;;  %s3639_s19 = smov [#allocation2]   ;;  %s256_s18 = int_to_ptr.vmem [resolvable:$true] %s255_s18 }
   0xa   : > { %p3716_p5 = pnand %p3698_p2, %p2941_p4  ;;  %s217_s20 = sshll.u32 %s3639_s19, 4  ;;  %s218_s20 = int_to_ptr.vmem [resolvable:$true] %s217_s20 }
   0xb   : > { %s238_s23 = sshll.u32 %s5038_s3, 4  ;;  %s3640_s25 = smov [#allocation6]   ;;  %s239_s23 = int_to_ptr.hbm [resolvable:$true] %s238_s23 }
   0xc   : > { %2947 = dma.hbm_to_vmem [thread:$0]  (!%p3716_p5), %s228_s27, 16, %s230_s9, [#allocation5]  }
   0xd   : > { %2953 = dma.hbm_to_vmem [thread:$0]  (!%p3716_p5), %s254_s12, 16, %s256_s18, [#allocation8]  }
   0xe   : > { %2944 = dma.hbm_to_vmem [thread:$0]  (!%p3716_p5), %s216_s15, 128, %s218_s20, [#allocation3]  }
   0xf   : > { %s240_s26 = sshll.u32 %s3640_s25, 4  ;;  %s268_s27 = sshll.u32 %s5041_s6, 4  ;;  %s241_s26 = int_to_ptr.vmem [resolvable:$true] %s240_s26  ;;  %s269_s27 = int_to_ptr.hbm [resolvable:$true] %s268_s27 }
  0x10   : > { %s3641_s9 = smov 64   ;;  %s3642_s11 = smov 4  }
  0x11   : > { %2950 = dma.hbm_to_vmem [thread:$0]  (!%p3716_p5), %s239_s23, 1024, %s241_s26, [#allocation5], %s3641_s9, %s3641_s9, %s3642_s11  }
  0x12   : > { %s3643_s12 = smov [#allocation9]   ;;  %292 = sbr.rel (%p3702_p3) target bundleno = 978 (0x3d2), region = 48 }
  0x13   : > { %s270_s13 = sshll.u32 %s3643_s12, 4  ;;  %s271_s13 = int_to_ptr.vmem [resolvable:$true] %s270_s13 }
  0x14   : > { %2956 = dma.hbm_to_vmem [thread:$0]  (!%p3716_p5), %s269_s27, 112, %s271_s13, [#allocation8]  }
  0x17   : > { %3622 = dma.done.wait (%p3698_p2), [#allocation3], 128  }
  0x18   : > { %3624 = vsyncadd (%p3698_p2), [#allocation3], 4294967168 }
  0x19   : > { %3626 = dma.done.wait (%p3698_p2), [#allocation5], 1040  }
  0x1a   : > { %3628 = vsyncadd (%p3698_p2), [#allocation5], 4294966256 }
  0x1b   : > { %3630 = dma.done.wait (%p3698_p2), [#allocation8], 128  }
  0x1c   : > { %3632 = vsyncadd (%p3698_p2), [#allocation8], 4294967168  ;;  %s2551_s30 = sshll.u32 %s2536_s28, 5  ;;  %vm396_vm0 = vcmask 64512   ;;  %v391_v0 = vld [vmem:[#allocation2] sm:$0xff]  ;;  %v2850_v12 = vld [vmem:[#allocation6 + $0x28] sm:$0xff] }
  0x1d   : > { %p347_p6 = scmp.lt.s32.totalorder %s2551_s30, 63  ;;  %508 = vmatpush.msra.mxu0 %v391_v0  ;;  %2909 = vmatpush.msra.mxu1 %v391_v0  ;;  %v2852_v8 = vld [vmem:[#allocation6 + $0x38] sm:$0xff]  ;;  %v2851_v11 = vld [vmem:[#allocation6 + $0x30] sm:$0xff]  ;;  %v2849_v15 = vld [vmem:[#allocation6 + $0x20] sm:$0xff]  ;;  %vm2080_vm1 = vcmask 130048   ;;  %vm2395_vm2 = vcmask 195712  }
  0x1e   : > { %2910 = vmatpush.msra.mxu2 %v391_v0  ;;  %2911 = vmatpush.msra.mxu3 %v391_v0  ;;  %v2848_v16 = vld [vmem:[#allocation6 + $0x18] sm:$0xff]  ;;  %v2847_v19 = vld [vmem:[#allocation6 + $0x10] sm:$0xff]  ;;  %v2846_v20 = vld [vmem:[#allocation6 + $0x8] sm:$0xff] }
  0x1f   : > { %s5047_s30 = smov (!%p347_p6, %s2551_s30), 63  ;;  %722 = vmatpush.bf16.msrb.mxu1 %v2852_v8  ;;  %v2845_v27 = vld [vmem:[#allocation6] sm:$0xff]  ;;  %v3804_v32 = vld [vmem:[#allocation4] ss:$0 sm:$0xff] }
  0x20   : > { %s2552_s14 = sshll.u32 %s5047_s30, 3  ;;  %s2920_s20 = smul.u32 56, %s5047_s30 }
  0x21   : > { %s3758_s17 = scalar_lea.vmem %s5035_s0, %s2552_s14  ;;  %s3644_s30 = smov 8  }
  0x22   : > { %v359_v1 = vld [vmem:[%s3758_s17] sm:$0xff]  ;;  %v360_v2 = vld [vmem:[%s3758_s17 + $0x8] sm:$0xff]  ;;  %v361_v3 = vld [vmem:[%s3758_s17 + $0x10] sm:$0xff]  ;;  %s4231_s23 = scalar_lea.vmem %s5042_s7, %s2920_s20 }
  0x23   : > { %2555 = vmatmul.msk.f32.vlgmr.msra.gmra.mxu0 %vm396_vm0, %v359_v1  ;;  %v362_v4 = vld [vmem:[%s3758_s17 + $0x18] sm:$0xff]  ;;  %v369_v5 = vld [vmem:[%s3758_s17 + $0x50] sm:$0xff]  ;;  %v363_v6 = vld [vmem:[%s3758_s17 + $0x20] sm:$0xff]  ;;  %723 = vmatpush.bf16.msrb.mxu1 %v2851_v11 }
  0x24   : > { %2565 = vmatmul.msk.f32.vlgmr.msra.gmra.mxu1 %vm396_vm0, %v369_v5  ;;  %v370_v7 = vld [vmem:[%s3758_s17 + $0x58] sm:$0xff]  ;;  %v364_v9 = vld [vmem:[%s3758_s17 + $0x28] sm:$0xff]  ;;  %v371_v10 = vld [vmem:[%s3758_s17 + $0x60] sm:$0xff] }
  0x25   : > { %v365_v13 = vld [vmem:[%s3758_s17 + $0x30] sm:$0xff]  ;;  %v372_v14 = vld [vmem:[%s3758_s17 + $0x68] sm:$0xff]  ;;  %v366_v17 = vld [vmem:[%s3758_s17 + $0x38] sm:$0xff] }
  0x26   : > { %v373_v18 = vld [vmem:[%s3758_s17 + $0x70] sm:$0xff]  ;;  %v367_v21 = vld [vmem:[%s3758_s17 + $0x40] sm:$0xff]  ;;  %v374_v22 = vld [vmem:[%s3758_s17 + $0x78] sm:$0xff] }
  0x27   : > { %724 = vmatpush.bf16.msrb.mxu1 %v2850_v12  ;;  %v368_v23 = vld [vmem:[%s3758_s17 + $0x48] sm:$0xff]  ;;  %v375_v24 = vld [vmem:[%s3758_s17 + $0x80] sm:$0xff]  ;;  %v378_v26 = vld [vmem:[%s3758_s17 + $0x98] sm:$0xff] }
  0x28   : > { %v376_v25 = vld [vmem:[%s3758_s17 + $0x88] sm:$0xff]  ;;  %2574 = vmatmul.msk.f32.vlgmr.msra.gmra.mxu2 %vm396_vm0, %v378_v26  ;;  %v377_v28 = vld [vmem:[%s3758_s17 + $0x90] sm:$0xff]  ;;  %v379_v29 = vld [vmem:[%s3758_s17 + $0xa0] sm:$0xff] }
  0x29   : > { %v380_v30 = vld [vmem:[%s3758_s17 + $0xa8] sm:$0xff]  ;;  %v381_v33 = vld [vmem:[%s3758_s17 + $0xb0] sm:$0xff]  ;;  %v382_v39 = vld [vmem:[%s3758_s17 + $0xb8] sm:$0xff] }
  0x2a   : > { %v383_v42 = vld [vmem:[%s3758_s17 + $0xc0] sm:$0xff]  ;;  %v384_v48 = vld [vmem:[%s3758_s17 + $0xc8] sm:$0xff]  ;;  %v386_v56 = vld [vmem:[%s3758_s17 + $0xd8] sm:$0xff] }
  0x2b   : > { %2556 = vmatmul.msk.f32.gmra.mxu0 %vm396_vm0, %v360_v2  ;;  %725 = vmatpush.bf16.msrb.mxu1 %v2849_v15  ;;  %v385_v58 = vld [vmem:[%s3758_s17 + $0xd0] sm:$0xff]  ;;  %v387_v60 = vld [vmem:[%s3758_s17 + $0xe0] sm:$0xff]  ;;  %v388_v1 = vld [vmem:[%s3758_s17 + $0xe8] sm:$0xff] }
  0x2c   : > { %2566 = vmatmul.msk.f32.gmra.mxu1 %vm396_vm0, %v370_v7  ;;  %2582 = vmatmul.msk.f32.vlgmr.msra.gmra.mxu3 %vm396_vm0, %v386_v56  ;;  %v2905_v7 = vld [vmem:[%s5040_s5 + $0x1a0] sm:$0xf0]  ;;  %v390_v15 = vld [vmem:[%s3758_s17 + $0xf8] sm:$0xff] }
  0x2f   : > { %726 = vmatpush.bf16.msrb.mxu1 %v2848_v16 }
  0x30   : > { %2575 = vmatmul.msk.f32.gmra.mxu2 %vm396_vm0, %v379_v29  ;;  %v2791_v29 = vld [vmem:[%s5040_s5 + $0x16c] sm:$0xf0] }
  0x33   : > { %2557 = vmatmul.msk.f32.gmra.mxu0 %vm396_vm0, %v361_v3  ;;  %727 = vmatpush.bf16.msrb.mxu1 %v2847_v19  ;;  %v2825_v19 = vld [vmem:[%s5040_s5 + $0x190] sm:$0xf] }
  0x34   : > { %2567 = vmatmul.msk.f32.gmra.mxu1 %vm396_vm0, %v371_v10  ;;  %2583 = vmatmul.msk.f32.gmra.mxu3 %vm396_vm0, %v387_v60  ;;  %v389_v10 = vld [vmem:[%s3758_s17 + $0xf0] sm:$0xff] }
  0x37   : > { %728 = vmatpush.bf16.msrb.mxu1 %v2846_v20  ;;  %v2906_v20 = vld [vmem:[%s5040_s5 + $0x1a8] sm:$0xf0] }
  0x38   : > { %2576 = vmatmul.msk.f32.gmra.mxu2 %vm396_vm0, %v380_v30  ;;  %v2797_v30 = vld [vmem:[%s5040_s5 + $0x158] sm:$0xf] }
  0x3b   : > { %2558 = vmatmul.msk.f32.gmra.mxu0 %vm396_vm0, %v362_v4  ;;  %729 = vmatpush.bf16.msrb.mxu1 %v2845_v27 }
  0x3c   : > { %2568 = vmatmul.msk.f32.gmra.mxu1 %vm396_vm0, %v372_v14  ;;  %2584 = vmatmul.msk.f32.gmra.mxu3 %vm396_vm0, %v388_v1 }
  0x40   : > { %2577 = vmatmul.msk.f32.gmra.mxu2 %vm396_vm0, %v381_v33  ;;  %v2899_v33 = vld [vmem:[%s5040_s5 + $0x170] sm:$0xf0] }
  0x43   : > { %2559 = vmatmul.msk.f32.gmra.mxu0 %vm396_vm0, %v363_v6  ;;  %v2817_v6 = vld [vmem:[%s5040_s5 + $0x188] sm:$0xf] }
  0x44   : > { %2569 = vmatmul.msk.f32.gmra.mxu1 %vm396_vm0, %v373_v18  ;;  %2585 = vmatmul.msk.f32.gmra.mxu3 %vm396_vm0, %v389_v10 }
  0x48   : > { %2578 = vmatmul.msk.f32.gmra.mxu2 %vm396_vm0, %v382_v39  ;;  %v2888_v39 = vld [vmem:[%s5040_s5 + $0x11c] sm:$0xf] }
  0x4b   : > { %2560 = vmatmul.msk.f32.gmra.mxu0 %vm396_vm0, %v364_v9  ;;  %v2818_v9 = vor.u32 %v2905_v7, %v2817_v6  ;;  %v2713_v6 = vld [vmem:[%s5040_s5 + $0xb0] sm:$0xf] }
  0x4c   : > { %2570 = vmatmul.msk.f32.gmra.mxu1 %vm396_vm0, %v374_v22  ;;  %2586 = vmatmul.msk.f32.gmra.mxu3 %vm396_vm0, %v390_v15  ;;  %v2826_v22 = vor.u32 %v2906_v20, %v2825_v19  ;;  %v2870_v15 = vld [vmem:[%s5040_s5 + $0x88] sm:$0xf0]  ;;  %v2860_v20 = vld [vmem:[%s5040_s5 + $0x3c] sm:$0xf] }
  0x4d   : > { %1227 = vmatpush.bf16.msrb.mxu2 %v2818_v9 }
  0x4e   : > { %1405 = vmatpush.bf16.msrb.mxu0 %v2826_v22 }
  0x50   : > { %2579 = vmatmul.msk.f32.gmra.mxu2 %vm396_vm0, %v383_v42 }
  0x53   : > { %2561 = vmatmul.msk.f32.gmra.mxu0 %vm396_vm0, %v365_v13 }
  0x54   : > { %2571 = vmatmul.msk.f32.gmra.mxu1 %vm396_vm0, %v375_v24  ;;  %v2789_v24 = vld [vmem:[%s5040_s5 + $0x150] sm:$0xf] }
  0x58   : > { %2580 = vmatmul.msk.f32.gmra.mxu2 %vm396_vm0, %v384_v48  ;;  %v2881_v48 = vld [vmem:[%s5040_s5 + $0xe4] sm:$0xf] }
  0x5b   : > { %2562 = vmatmul.msk.f32.gmra.mxu0 %vm396_vm0, %v366_v17 }
  0x5c   : > { %2572 = vmatmul.msk.f32.gmra.mxu1 %vm396_vm0, %v376_v25  ;;  %v2898_v25 = vld [vmem:[%s5040_s5 + $0x168] sm:$0xf0] }
  0x5d   : > { %v2790_v27 = vor.u32 %v2898_v25, %v2789_v24  ;;  %v2649_v24 = vld [vmem:[%s5040_s5 + $0x38] sm:$0xf]  ;;  %v2863_v25 = vld [vmem:[%s5040_s5 + $0x50] sm:$0xf0] }
  0x5f   : > { %1228 = vmatpush.bf16.msrb.mxu2 %v2790_v27  ;;  %v2650_v27 = vor.u32 %v2863_v25, %v2649_v24 }
  0x60   : > { %2581 = vmatmul.msk.f32.gmra.mxu2 %vm396_vm0, %v385_v58  ;;  %v2707_v58 = vld [vmem:[%s5040_s5 + $0xc4] sm:$0xf0] }
  0x63   : > { %2563 = vmatmul.msk.f32.gmra.mxu0 %vm396_vm0, %v367_v21  ;;  %v2902_v21 = vld [vmem:[%s5040_s5 + $0x18c] sm:$0xf] }
  0x64   : > { %2573 = vmatmul.msk.f32.gmra.mxu1 %vm396_vm0, %v377_v28  ;;  %v2895_v28 = vld [vmem:[%s5040_s5 + $0x154] sm:$0xf] }
  0x6b   : > { %2564 = vmatmul.msk.f32.gmra.mxu0 %vm396_vm0, %v368_v23  ;;  %v2819_v23 = vld [vmem:[%s5040_s5 + $0x1a4] sm:$0xf0] }
  0x6c   : > { %v2822_v26 = vor.u32 %v2902_v21, %v2819_v23  ;;  %v2651_v21 = vld [vmem:[%s5040_s5 + $0x54] sm:$0xf0] }
  0x6d   : > { %v2654_v23 = vor.u32 %v2860_v20, %v2651_v21 }
  0x6e   : > { %1316 = vmatpush.bf16.msrb.mxu3 %v2822_v26  ;;  %v2657_v26 = vld [vmem:[%s5040_s5 + $0x40] sm:$0xf] }
  0xa0   : > { %v510_v31 = vpop.f32.mrf.mxu0 }
  0xa1   : > { %v511_v34 = vadd.f32 %v3804_v32, %v510_v31  ;;  %v540_v61 = vpop.f32.mrf.mxu1 }
  0xa3   : > { %v606_v37 = vmax.f32 %v511_v34, 0.0  ;;  %v2761_v34 = vld [vmem:[%s5040_s5 + $0x118] sm:$0xf] }
  0xa8   : > { %v513_v35 = vpop.f32.mrf.mxu0 }
  0xa9   : > { %v514_v36 = vadd.f32 %v3804_v32, %v513_v35  ;;  %v543_v5 = vpop.f32.mrf.mxu1  ;;  %v2891_v35 = vld [vmem:[%s5040_s5 + $0x130] sm:$0xf0] }
  0xaa   : > { %v544_v42 = vadd.f32 %v3804_v32, %v543_v5  ;;  %v2877_v5 = vld [vmem:[%s5040_s5 + $0xc0] sm:$0xf0] }
  0xab   : > { %v607_v38 = vmax.f32 %v514_v36, 0.0  ;;  %v2794_v36 = vor.u32 %v2895_v28, %v2791_v29  ;;  %v2864_v28 = vld [vmem:[%s5040_s5 + $0x58] sm:$0xf0] }
  0xac   : > { %v2658_v29 = vor.u32 %v2864_v28, %v2657_v26 }
  0xad   : > { %v638_v40 = vpack.c.bf16 %v607_v38, %v606_v37  ;;  %v2798_v37 = vor.u32 %v2899_v33, %v2797_v30  ;;  %v2762_v38 = vor.u32 %v2891_v35, %v2761_v34  ;;  %1317 = vmatpush.bf16.msrb.mxu3 %v2794_v36  ;;  %v2853_v33 = vld [vmem:[%s5040_s5 + $0x4] sm:$0xf]  ;;  %v2623_v34 = vld [vmem:[%s5040_s5 + $0x1c] sm:$0xf0] }
  0xae   : > { %v2621_v35 = vld [vmem:[%s5040_s5] sm:$0xf]  ;;  %v2626_v36 = vor.u32 %v2853_v33, %v2623_v34 }
  0xaf   : > { %730 = vmatmul.bf16.vlgmr.msrb.gmra.mxu1 %v638_v40  ;;  %v2763_v40 = vld [vmem:[%s5040_s5 + $0x134] sm:$0xf0]  ;;  %1406 = vmatpush.bf16.msrb.mxu0 %v2798_v37  ;;  %v2856_v37 = vld [vmem:[%s5040_s5 + $0x18] sm:$0xf0] }
  0xb0   : > { %v516_v41 = vpop.f32.mrf.mxu0  ;;  %1229 = vmatpush.bf16.msrb.mxu2 %v2762_v38  ;;  %v2629_v38 = vld [vmem:[%s5040_s5 + $0x8] sm:$0xf] }
  0xb1   : > { %v517_v43 = vadd.f32 %v3804_v32, %v516_v41  ;;  %v546_v13 = vpop.f32.mrf.mxu1  ;;  %v541_v41 = vadd.f32 %v3804_v32, %v540_v61  ;;  %v2885_v61 = vld [vmem:[%s5040_s5 + $0x100] sm:$0xf0] }
  0xb3   : > { %v608_v46 = vmax.f32 %v517_v43, 0.0  ;;  %v2766_v43 = vor.u32 %v2888_v39, %v2763_v40  ;;  %v2857_v39 = vld [vmem:[%s5040_s5 + $0x20] sm:$0xf0]  ;;  %v2622_v40 = vor.u32 %v2856_v37, %v2621_v35  ;;  %v2805_v35 = vld [vmem:[%s5040_s5 + $0x160] sm:$0xf] }
  0xb5   : > { %1318 = vmatpush.bf16.msrb.mxu3 %v2766_v43 }
  0xb8   : > { %v519_v44 = vpop.f32.mrf.mxu0 }
  0xb9   : > { %v520_v45 = vadd.f32 %v3804_v32, %v519_v44  ;;  %v549_v31 = vpop.f32.mrf.mxu1  ;;  %v616_v44 = vmax.f32 %v541_v41, 0.0  ;;  %v2630_v41 = vor.u32 %v2857_v39, %v2629_v38  ;;  %v2896_v38 = vld [vmem:[%s5040_s5 + $0x15c] sm:$0xf]  ;;  %v2799_v39 = vld [vmem:[%s5040_s5 + $0x174] sm:$0xf0] }
  0xbb   : > { %v609_v47 = vmax.f32 %v520_v45, 0.0  ;;  %v617_v45 = vmax.f32 %v544_v42, 0.0 }
  0xbd   : > { %v639_v49 = vpack.c.bf16 %v609_v47, %v608_v46  ;;  %v643_v47 = vpack.c.bf16 %v617_v45, %v616_v44  ;;  %v2904_v45 = vld [vmem:[%s5040_s5 + $0x19c] sm:$0xf] }
  0xbf   : > { %735 = vmatmul.bf16.gmra.mxu1 %v639_v49  ;;  %v2735_v49 = vld [vmem:[%s5040_s5 + $0xfc] sm:$0xf0] }
  0xc0   : > { %v522_v50 = vpop.f32.mrf.mxu0 }
  0xc1   : > { %v523_v51 = vadd.f32 %v3804_v32, %v522_v50  ;;  %v552_v46 = vpop.f32.mrf.mxu1  ;;  %v2733_v50 = vld [vmem:[%s5040_s5 + $0xe0] sm:$0xf] }
  0xc2   : > { %v553_v30 = vadd.f32 %v3804_v32, %v552_v46  ;;  %v2835_v46 = vld [vmem:[%s5040_s5 + $0x1b4] sm:$0xf0] }
  0xc3   : > { %v610_v54 = vmax.f32 %v523_v51, 0.0  ;;  %v2738_v51 = vor.u32 %v2881_v48, %v2735_v49  ;;  %v2838_v48 = vor.u32 %v2904_v45, %v2835_v46 }
  0xc4   : > { %v620_v42 = vmax.f32 %v553_v30, 0.0 }
  0xc5   : > { %1319 = vmatpush.bf16.msrb.mxu3 %v2738_v51 }
  0xc8   : > { %v525_v52 = vpop.f32.mrf.mxu0 }
  0xc9   : > { %v526_v53 = vadd.f32 %v3804_v32, %v525_v52  ;;  %v2884_v52 = vld [vmem:[%s5040_s5 + $0xf8] sm:$0xf0]  ;;  %v555_v1 = vpop.f32.mrf.mxu1 }
  0xcb   : > { %v611_v55 = vmax.f32 %v526_v53, 0.0  ;;  %v2769_v53 = vld [vmem:[%s5040_s5 + $0x120] sm:$0xf] }
  0xcd   : > { %v640_v57 = vpack.c.bf16 %v611_v55, %v610_v54  ;;  %v2892_v54 = vld [vmem:[%s5040_s5 + $0x138] sm:$0xf0]  ;;  %v2734_v55 = vor.u32 %v2884_v52, %v2733_v50  ;;  %v567_v52 = vpop.f32.mrf.mxu2 }
  0xce   : > { %v2770_v56 = vor.u32 %v2892_v54, %v2769_v53 }
  0xcf   : > { %740 = vmatmul.bf16.gmra.mxu1 %v640_v57  ;;  %v2874_v57 = vld [vmem:[%s5040_s5 + $0xac] sm:$0xf]  ;;  %1230 = vmatpush.bf16.msrb.mxu2 %v2734_v55 }
  0xd0   : > { %v528_v59 = vpop.f32.mrf.mxu0  ;;  %v2710_v60 = vor.u32 %v2874_v57, %v2707_v58  ;;  %1407 = vmatpush.bf16.msrb.mxu0 %v2770_v56  ;;  %v3994_v57 = vld [vmem:[#allocation7] ss:$0 sm:$0xff]  ;;  %v2833_v58 = vld [vmem:[%s5040_s5 + $0x198] sm:$0xf] }
  0xd1   : > { %v529_v62 = vadd.f32 %v3804_v32, %v528_v59  ;;  %v2741_v59 = vld [vmem:[%s5040_s5 + $0xe8] sm:$0xf]  ;;  %v558_v22 = vpop.f32.mrf.mxu1 }
  0xd2   : > { %1320 = vmatpush.bf16.msrb.mxu3 %v2710_v60  ;;  %v559_v50 = vadd.f32 %v3804_v32, %v558_v22 }
  0xd3   : > { %v612_v2 = vmax.f32 %v529_v62, 0.0  ;;  %v2742_v62 = vor.u32 %v2885_v61, %v2741_v59  ;;  %v2907_v59 = vld [vmem:[%s5040_s5 + $0x1b0] sm:$0xf0] }
  0xd4   : > { %v622_v53 = vmax.f32 %v559_v50, 0.0  ;;  %v2834_v61 = vor.u32 %v2907_v59, %v2833_v58  ;;  %v2813_v58 = vld [vmem:[%s5040_s5 + $0x168] sm:$0xf]  ;;  %v2901_v59 = vld [vmem:[%s5040_s5 + $0x180] sm:$0xf0] }
  0xd5   : > { %1408 = vmatpush.bf16.msrb.mxu0 %v2742_v62  ;;  %v570_v60 = vpop.f32.mrf.mxu2  ;;  %v2903_v62 = vld [vmem:[%s5040_s5 + $0x194] sm:$0xf] }
  0xd8   : > { %v531_v63 = vpop.f32.mrf.mxu0 }
  0xd9   : > { %v532_v0 = vadd.f32 %v3804_v32, %v531_v63  ;;  %v547_v63 = vadd.f32 %v3804_v32, %v546_v13  ;;  %v2677_v13 = vld [vmem:[%s5040_s5 + $0x70] sm:$0xf]  ;;  %v561_v44 = vpop.f32.mrf.mxu1 }
  0xda   : > { %v562_v51 = vadd.f32 %v3804_v32, %v561_v44 }
  0xdb   : > { %v613_v3 = vmax.f32 %v532_v0, 0.0  ;;  %v550_v0 = vadd.f32 %v3804_v32, %v549_v31  ;;  %v556_v31 = vadd.f32 %v3804_v32, %v555_v1 }
  0xdc   : > { %v623_v54 = vmax.f32 %v562_v51, 0.0 }
  0xdd   : > { %v641_v4 = vpack.c.bf16 %v613_v3, %v612_v2  ;;  %v618_v2 = vmax.f32 %v547_v63, 0.0  ;;  %v619_v3 = vmax.f32 %v550_v0, 0.0  ;;  %v621_v43 = vmax.f32 %v556_v31, 0.0  ;;  %v2827_v63 = vld [vmem:[%s5040_s5 + $0x1ac] sm:$0xf0] }
  0xde   : > { %v646_v56 = vpack.c.bf16 %v623_v54, %v622_v53  ;;  %v2830_v0 = vor.u32 %v2903_v62, %v2827_v63  ;;  %v2890_v53 = vld [vmem:[%s5040_s5 + $0x12c] sm:$0xf]  ;;  %v2779_v54 = vld [vmem:[%s5040_s5 + $0x144] sm:$0xf0] }
  0xdf   : > { %745 = vmatmul.bf16.gmra.mxu1 %v641_v4  ;;  %v2705_v4 = vld [vmem:[%s5040_s5 + $0xa8] sm:$0xf]  ;;  %v644_v10 = vpack.c.bf16 %v619_v3, %v618_v2 }
  0xe0   : > { %v534_v8 = vpop.f32.mrf.mxu0  ;;  %v2706_v7 = vor.u32 %v2877_v5, %v2705_v4  ;;  %1494 = vmatpush.bf16.msra.mxu1 %v2830_v0  ;;  %v568_v4 = vadd.f32 %v3804_v32, %v567_v52 }
  0xe1   : > { %v535_v11 = vadd.f32 %v3804_v32, %v534_v8  ;;  %v2878_v8 = vld [vmem:[%s5040_s5 + $0xc8] sm:$0xf0]  ;;  %v564_v49 = vpop.f32.mrf.mxu1 }
  0xe2   : > { %v2714_v9 = vor.u32 %v2878_v8, %v2713_v6  ;;  %1231 = vmatpush.bf16.msrb.mxu2 %v2706_v7  ;;  %v565_v3 = vadd.f32 %v3804_v32, %v564_v49 }
  0xe3   : > { %v614_v16 = vmax.f32 %v535_v11, 0.0  ;;  %v2867_v11 = vld [vmem:[%s5040_s5 + $0x74] sm:$0xf] }
  0xe4   : > { %1409 = vmatpush.bf16.msrb.mxu0 %v2714_v9  ;;  %v624_v8 = vmax.f32 %v565_v3, 0.0  ;;  %v625_v9 = vmax.f32 %v568_v4, 0.0 }
  0xe8   : > { %v537_v12 = vpop.f32.mrf.mxu0 }
  0xe9   : > { %v538_v14 = vadd.f32 %v3804_v32, %v537_v12  ;;  %v2679_v12 = vld [vmem:[%s5040_s5 + $0x8c] sm:$0xf0] }
  0xeb   : > { %v615_v17 = vmax.f32 %v538_v14, 0.0  ;;  %v2682_v14 = vor.u32 %v2867_v11, %v2679_v12  ;;  %v573_v11 = vpop.f32.mrf.mxu2 }
  0xec   : > { %v574_v24 = vadd.f32 %v3804_v32, %v573_v11 }
  0xed   : > { %v642_v18 = vpack.c.bf16 %v615_v17, %v614_v16  ;;  %v2685_v16 = vld [vmem:[%s5040_s5 + $0x78] sm:$0xf]  ;;  %v2871_v17 = vld [vmem:[%s5040_s5 + $0x90] sm:$0xf0]  ;;  %1321 = vmatpush.bf16.msrb.mxu3 %v2682_v14  ;;  %v2807_v14 = vld [vmem:[%s5040_s5 + $0x17c] sm:$0xf0] }
  0xee   : > { %v2686_v19 = vor.u32 %v2871_v17, %v2685_v16  ;;  %v2841_v17 = vld [vmem:[%s5040_s5 + $0x1a0] sm:$0xf] }
  0xef   : > { %750 = vmatmul.bf16.gmra.mxu1 %v642_v18  ;;  %v2678_v18 = vor.u32 %v2870_v15, %v2677_v13  ;;  %v2897_v13 = vld [vmem:[%s5040_s5 + $0x164] sm:$0xf]  ;;  %v647_v15 = vpack.c.bf16 %v625_v9, %v624_v8  ;;  %v591_v8 = vpop.f32.mrf.mxu3 }
  0xf0   : > { %1410 = vmatpush.bf16.msrb.mxu0 %v2686_v19  ;;  %v2810_v16 = vor.u32 %v2897_v13, %v2807_v14  ;;  %v2893_v13 = vld [vmem:[%s5040_s5 + $0x140] sm:$0xf0] }
  0xf1   : > { %1232 = vmatpush.bf16.msrb.mxu2 %v2678_v18  ;;  %1322 = vmatpush.bf16.msrb.mxu3 %v2654_v23  ;;  %v2908_v18 = vld [vmem:[%s5040_s5 + $0x1b8] sm:$0xf0]  ;;  %v571_v23 = vadd.f32 %v3804_v32, %v570_v60  ;;  %v4074_v60 = vor.u32 %v2901_v59, %v2813_v58  ;;  %v2861_v58 = vld [vmem:[%s5040_s5 + $0x44] sm:$0xf]  ;;  %v2659_v59 = vld [vmem:[%s5040_s5 + $0x5c] sm:$0xf0] }
  0xf2   : > { %v4029_v19 = vor.u32 %v2908_v18, %v2841_v17  ;;  %v2771_v17 = vld [vmem:[%s5040_s5 + $0x13c] sm:$0xf0] }
  0xf3   : > { %v576_v22 = vpop.f32.mrf.mxu2  ;;  %v626_v28 = vmax.f32 %v571_v23, 0.0 }
  0xf4   : > { %1411 = vmatpush.bf16.msrb.mxu0 %v2658_v29  ;;  %v627_v29 = vmax.f32 %v574_v24, 0.0 }
  0xf5   : > { %1233 = vmatpush.bf16.msrb.mxu2 %v2650_v27  ;;  %1323 = vmatpush.bf16.msrb.mxu3 %v2626_v36  ;;  %v2900_v36 = vld [vmem:[%s5040_s5 + $0x178] sm:$0xf0] }
  0xf6   : > { %v648_v33 = vpack.c.bf16 %v627_v29, %v626_v28  ;;  %v2806_v37 = vor.u32 %v2900_v36, %v2805_v35 }
  0xf7   : > { %v594_v24 = vpop.f32.mrf.mxu3 }
  0xf8   : > { %1412 = vmatpush.bf16.msrb.mxu0 %v2630_v41 }
  0xf9   : > { %1234 = vmatpush.bf16.msrb.mxu2 %v2622_v40  ;;  %1672 = vmatpush.bf16.msra.mxu3 %v2838_v48  ;;  %v2802_v40 = vor.u32 %v2896_v38, %v2799_v39  ;;  %v2883_v38 = vld [vmem:[%s5040_s5 + $0xf4] sm:$0xf]  ;;  %v2751_v39 = vld [vmem:[%s5040_s5 + $0x10c] sm:$0xf0] }
  0xfb   : > { %v579_v34 = vpop.f32.mrf.mxu2  ;;  %1495 = vmatpush.bf16.msra.mxu1 %v2802_v40  ;;  %v2754_v40 = vor.u32 %v2883_v38, %v2751_v39  ;;  %v2757_v39 = vld [vmem:[%s5040_s5 + $0xf8] sm:$0xf] }
  0xfc   : > { %1761 = vmatpush.bf16.msra.mxu0 %v4029_v19  ;;  %v580_v44 = vadd.f32 %v3804_v32, %v579_v34  ;;  %v2743_v34 = vld [vmem:[%s5040_s5 + $0x104] sm:$0xf0] }
  0xfd   : > { %1583 = vmatpush.bf16.msra.mxu2 %v2834_v61  ;;  %1673 = vmatpush.bf16.msra.mxu3 %v2810_v16  ;;  %v2889_v16 = vld [vmem:[%s5040_s5 + $0x124] sm:$0xf] }
  0xfe   : > { %v629_v50 = vmax.f32 %v580_v44, 0.0  ;;  %v2774_v18 = vor.u32 %v2889_v16, %v2771_v17 }
  0xff   : > { %755 = vmatmul.bf16.gmra.mxu1 %v643_v47  ;;  %v645_v47 = vpack.c.bf16 %v621_v43, %v620_v42  ;;  %v577_v43 = vadd.f32 %v3804_v32, %v576_v22 }
 0x100   : > { %1762 = vmatpush.bf16.msra.mxu0 %v4074_v60  ;;  %1496 = vmatpush.bf16.msra.mxu1 %v2774_v18 }
 0x101   : > { %1584 = vmatpush.bf16.msra.mxu2 %v2806_v37  ;;  %v628_v49 = vmax.f32 %v577_v43, 0.0  ;;  %v2715_v43 = vld [vmem:[%s5040_s5 + $0xcc] sm:$0xf0] }
 0x103   : > { %v582_v48 = vpop.f32.mrf.mxu2 }
 0x104   : > { %v583_v0 = vadd.f32 %v3804_v32, %v582_v48  ;;  %v2868_v48 = vld [vmem:[%s5040_s5 + $0x7c] sm:$0xf] }
 0x10b   : > { %v585_v61 = vpop.f32.mrf.mxu2 }
 0x10f   : > { %760 = vmatmul.bf16.gmra.mxu1 %v644_v10 }
 0x113   : > { %v588_v14 = vpop.f32.mrf.mxu2 }
 0x114   : > { %v589_v22 = vadd.f32 %v3804_v32, %v588_v14 }
 0x116   : > { %v632_v29 = vmax.f32 %v589_v22, 0.0 }
 0x11f   : > { %765 = vmatmul.bf16.gmra.mxu1 %v645_v47 }
 0x12c   : > { %v731_v55 = vpop.f32.mrf.mxu1 }
 0x12d   : > { %v732_v1 = vadd.f32 %v3994_v57, %v731_v55  ;;  %v649_v55 = vpack.c.bf16 %v629_v50, %v628_v49  ;;  %v2687_v49 = vld [vmem:[%s5040_s5 + $0x94] sm:$0xf0] }
 0x12f   : > { %770 = vmatmul.bf16.gmra.mxu1 %v646_v56  ;;  %v811_v6 = vmax.f32 %v732_v1, 0.0  ;;  %v2782_v56 = vor.u32 %v2890_v53, %v2779_v54  ;;  %v586_v1 = vadd.f32 %v3804_v32, %v585_v61  ;;  %v595_v54 = vadd.f32 %v3804_v32, %v594_v24 }
 0x131   : > { %1674 = vmatpush.bf16.msra.mxu3 %v2782_v56 }
 0x134   : > { %v733_v2 = vpop.f32.mrf.mxu1 }
 0x135   : > { %v734_v5 = vadd.f32 %v3994_v57, %v733_v2  ;;  %1675 = vmatpush.bf16.msra.mxu3 %v2754_v40  ;;  %v2887_v40 = vld [vmem:[%s5040_s5 + $0x110] sm:$0xf0] }
 0x137   : > { %v812_v7 = vmax.f32 %v734_v5, 0.0  ;;  %v630_v5 = vmax.f32 %v583_v0, 0.0 }
 0x139   : > { %v4012_v10 = vpack.c.bf16 %v812_v7, %v811_v6  ;;  %v631_v6 = vmax.f32 %v586_v1, 0.0  ;;  %v634_v1 = vmax.f32 %v595_v54, 0.0 }
 0x13b   : > { %1235 = vmatmul.bf16.vlgmr.msrb.gmra.mxu2 %v4012_v10  ;;  %1324 = vmatmul.bf16.vlgmr.msrb.gmra.mxu3 %v4012_v10  ;;  %v650_v11 = vpack.c.bf16 %v631_v6, %v630_v5  ;;  %v2631_v5 = vld [vmem:[%s5040_s5 + $0x24] sm:$0xf0] }
 0x13c   : > { %1413 = vmatmul.bf16.vlgmr.msrb.gmra.mxu0 %v4012_v10  ;;  %v736_v12 = vpop.f32.mrf.mxu1 }
 0x13d   : > { %v737_v20 = vadd.f32 %v3994_v57, %v736_v12  ;;  %v2777_v12 = vld [vmem:[%s5040_s5 + $0x128] sm:$0xf] }
 0x13f   : > { %775 = vmatmul.bf16.gmra.mxu1 %v647_v15  ;;  %v813_v26 = vmax.f32 %v737_v20, 0.0  ;;  %v2778_v15 = vor.u32 %v2893_v13, %v2777_v12  ;;  %v2886_v12 = vld [vmem:[%s5040_s5 + $0x108] sm:$0xf0] }
 0x141   : > { %1585 = vmatpush.bf16.msra.mxu2 %v2778_v15 }
 0x144   : > { %v738_v21 = vpop.f32.mrf.mxu1 }
 0x145   : > { %v739_v25 = vadd.f32 %v3994_v57, %v738_v21  ;;  %v592_v21 = vadd.f32 %v3804_v32, %v591_v8 }
 0x147   : > { %v814_v27 = vmax.f32 %v739_v25, 0.0 }
 0x149   : > { %v4036_v30 = vpack.c.bf16 %v814_v27, %v813_v26  ;;  %v633_v27 = vmax.f32 %v592_v21, 0.0 }
 0x14b   : > { %1240 = vmatmul.bf16.gmra.mxu2 %v4036_v30  ;;  %1329 = vmatmul.bf16.gmra.mxu3 %v4036_v30  ;;  %v651_v35 = vpack.c.bf16 %v633_v27, %v632_v29  ;;  %v2723_v29 = vld [vmem:[%s5040_s5 + $0xd4] sm:$0xf0] }
 0x14c   : > { %1418 = vmatmul.bf16.gmra.mxu0 %v4036_v30  ;;  %v741_v31 = vpop.f32.mrf.mxu1 }
 0x14d   : > { %v742_v41 = vadd.f32 %v3994_v57, %v741_v31 }
 0x14f   : > { %780 = vmatmul.bf16.gmra.mxu1 %v648_v33  ;;  %v815_v46 = vmax.f32 %v742_v41, 0.0  ;;  %v2882_v33 = vld [vmem:[%s5040_s5 + $0xec] sm:$0xf]  ;;  %v597_v41 = vpop.f32.mrf.mxu3 }
 0x150   : > { %v2746_v36 = vor.u32 %v2882_v33, %v2743_v34 }
 0x152   : > { %1497 = vmatpush.bf16.msra.mxu1 %v2746_v36 }
 0x154   : > { %v743_v42 = vpop.f32.mrf.mxu1 }
 0x155   : > { %v744_v45 = vadd.f32 %v3994_v57, %v743_v42  ;;  %v2875_v42 = vld [vmem:[%s5040_s5 + $0xb4] sm:$0xf] }
 0x156   : > { %v2718_v44 = vor.u32 %v2875_v42, %v2715_v43  ;;  %v4195_v42 = vor.u32 %v2887_v40, %v2757_v39 }
 0x157   : > { %v816_v47 = vmax.f32 %v744_v45, 0.0  ;;  %v2785_v45 = vld [vmem:[%s5040_s5 + $0x130] sm:$0xf]  ;;  %v600_v0 = vpop.f32.mrf.mxu3 }
 0x158   : > { %1498 = vmatpush.bf16.msra.mxu1 %v2718_v44  ;;  %v601_v17 = vadd.f32 %v3804_v32, %v600_v0  ;;  %v4200_v44 = vld [vmem:[#allocation9] sm:$0x7f] }
 0x159   : > { %v4057_v51 = vpack.c.bf16 %v816_v47, %v815_v46  ;;  %v2894_v46 = vld [vmem:[%s5040_s5 + $0x148] sm:$0xf0] }
 0x15a   : > { %v4131_v47 = vor.u32 %v2894_v46, %v2785_v45  ;;  %v2721_v45 = vld [vmem:[%s5040_s5 + $0xb8] sm:$0xf]  ;;  %v2879_v46 = vld [vmem:[%s5040_s5 + $0xd0] sm:$0xf0] }
 0x15b   : > { %1245 = vmatmul.bf16.gmra.mxu2 %v4057_v51  ;;  %1334 = vmatmul.bf16.gmra.mxu3 %v4057_v51 }
 0x15c   : > { %1423 = vmatmul.bf16.gmra.mxu0 %v4057_v51  ;;  %v746_v52 = vpop.f32.mrf.mxu1 }
 0x15d   : > { %v747_v62 = vadd.f32 %v3994_v57, %v746_v52  ;;  %1763 = vmatpush.bf16.msra.mxu0 %v4131_v47  ;;  %v2690_v52 = vor.u32 %v2868_v48, %v2687_v49  ;;  %v2722_v49 = vor.u32 %v2879_v46, %v2721_v45 }
 0x15f   : > { %785 = vmatmul.bf16.gmra.mxu1 %v649_v55  ;;  %v817_v3 = vmax.f32 %v747_v62, 0.0  ;;  %v598_v55 = vadd.f32 %v3804_v32, %v597_v41  ;;  %v603_v14 = vpop.f32.mrf.mxu3 }
 0x160   : > { %1499 = vmatpush.bf16.msra.mxu1 %v2690_v52  ;;  %v604_v18 = vadd.f32 %v3804_v32, %v603_v14  ;;  %v2876_v32 = vld [vmem:[%s5040_s5 + $0xbc] sm:$0xf]  ;;  %v4210_v52 = vperm.slane %v4200_v44, 2 }
 0x161   : > { %v2726_v34 = vor.u32 %v2876_v32, %v2723_v29  ;;  %1764 = vmatpush.bf16.msra.mxu0 %v4195_v42  ;;  %v2729_v32 = vld [vmem:[%s5040_s5 + $0xc0] sm:$0xf]  ;;  %v2880_v29 = vld [vmem:[%s5040_s5 + $0xd8] sm:$0xf0] }
 0x162   : > { %v637_v24 = vmax.f32 %v604_v18, 0.0 }
 0x163   : > { %1676 = vmatpush.bf16.msra.mxu3 %v2726_v34  ;;  %v4260_v34 = vor.u32 %v2880_v29, %v2729_v32 }
 0x164   : > { %v748_v63 = vpop.f32.mrf.mxu1 }
 0x165   : > { %v749_v2 = vadd.f32 %v3994_v57, %v748_v63  ;;  %v2662_v63 = vor.u32 %v2861_v58, %v2659_v59  ;;  %v4218_v59 = vperm.slane %v4200_v44, 0  ;;  %1765 = vmatpush.bf16.msra.mxu0 %v4260_v34 }
 0x167   : > { %v818_v4 = vmax.f32 %v749_v2, 0.0  ;;  %v635_v2 = vmax.f32 %v598_v55, 0.0  ;;  %1500 = vmatpush.bf16.msra.mxu1 %v2662_v63 }
 0x169   : > { %v4081_v7 = vpack.c.bf16 %v818_v4, %v817_v3  ;;  %v2854_v4 = vld [vmem:[%s5040_s5 + $0xc] sm:$0xf] }
 0x16a   : > { %v2634_v6 = vor.u32 %v2854_v4, %v2631_v5 }
 0x16b   : > { %1250 = vmatmul.bf16.gmra.mxu2 %v4081_v7  ;;  %1339 = vmatmul.bf16.gmra.mxu3 %v4081_v7 }
 0x16c   : > { %1428 = vmatmul.bf16.gmra.mxu0 %v4081_v7  ;;  %v751_v9 = vpop.f32.mrf.mxu1  ;;  %1501 = vmatpush.bf16.msra.mxu1 %v2634_v6 }
 0x16d   : > { %v752_v20 = vadd.f32 %v3994_v57, %v751_v9  ;;  %v652_v9 = vpack.c.bf16 %v635_v2, %v634_v1 }
 0x16f   : > { %790 = vmatmul.bf16.gmra.mxu1 %v650_v11  ;;  %v819_v26 = vmax.f32 %v752_v20, 0.0  ;;  %v2749_v11 = vld [vmem:[%s5040_s5 + $0xf0] sm:$0xf] }
 0x170   : > { %v2750_v13 = vor.u32 %v2886_v12, %v2749_v11  ;;  %v2695_v11 = vld [vmem:[%s5040_s5 + $0x9c] sm:$0xf0] }
 0x172   : > { %1586 = vmatpush.bf16.msra.mxu2 %v2750_v13 }
 0x174   : > { %v753_v23 = vpop.f32.mrf.mxu1 }
 0x175   : > { %v754_v25 = vadd.f32 %v3994_v57, %v753_v23  ;;  %v636_v23 = vmax.f32 %v601_v17, 0.0 }
 0x176   : > { %1587 = vmatpush.bf16.msra.mxu2 %v2722_v49  ;;  %v2693_v49 = vld [vmem:[%s5040_s5 + $0x80] sm:$0xf] }
 0x177   : > { %v820_v28 = vmax.f32 %v754_v25, 0.0  ;;  %v653_v27 = vpack.c.bf16 %v637_v24, %v636_v23 }
 0x179   : > { %v4102_v31 = vpack.c.bf16 %v820_v28, %v819_v26 }
 0x17b   : > { %1255 = vmatmul.bf16.gmra.mxu2 %v4102_v31  ;;  %1344 = vmatmul.bf16.gmra.mxu3 %v4102_v31 }
 0x17c   : > { %1433 = vmatmul.bf16.gmra.mxu0 %v4102_v31  ;;  %v756_v37 = vpop.f32.mrf.mxu1 }
 0x17d   : > { %v757_v50 = vadd.f32 %v3994_v57, %v756_v37 }
 0x17f   : > { %795 = vmatmul.bf16.gmra.mxu1 %v651_v35  ;;  %v821_v61 = vmax.f32 %v757_v50, 0.0 }
 0x184   : > { %v758_v53 = vpop.f32.mrf.mxu1 }
 0x185   : > { %v759_v56 = vadd.f32 %v3994_v57, %v758_v53 }
 0x187   : > { %v822_v62 = vmax.f32 %v759_v56, 0.0 }
 0x189   : > { %v4150_v3 = vpack.c.bf16 %v822_v62, %v821_v61  ;;  %v4221_v61 = vperm.slane %v4200_v44, 1 }
 0x18b   : > { %1260 = vmatmul.bf16.gmra.mxu2 %v4150_v3  ;;  %1349 = vmatmul.bf16.gmra.mxu3 %v4150_v3 }
 0x18c   : > { %1438 = vmatmul.bf16.gmra.mxu0 %v4150_v3  ;;  %v761_v8 = vpop.f32.mrf.mxu1 }
 0x18d   : > { %v762_v15 = vadd.f32 %v3994_v57, %v761_v8 }
 0x18f   : > { %800 = vmatmul.bf16.gmra.mxu1 %v652_v9  ;;  %v823_v21 = vmax.f32 %v762_v15, 0.0  ;;  %v2869_v9 = vld [vmem:[%s5040_s5 + $0x84] sm:$0xf] }
 0x190   : > { %v2698_v13 = vor.u32 %v2869_v9, %v2695_v11 }
 0x192   : > { %1677 = vmatpush.bf16.msra.mxu3 %v2698_v13 }
 0x194   : > { %v763_v16 = vpop.f32.mrf.mxu1 }
 0x195   : > { %v764_v20 = vadd.f32 %v3994_v57, %v763_v16 }
 0x197   : > { %v824_v22 = vmax.f32 %v764_v20, 0.0 }
 0x199   : > { %v4171_v25 = vpack.c.bf16 %v824_v22, %v823_v21 }
 0x19b   : > { %1265 = vmatmul.bf16.gmra.mxu2 %v4171_v25  ;;  %1354 = vmatmul.bf16.gmra.mxu3 %v4171_v25 }
 0x19c   : > { %1443 = vmatmul.bf16.gmra.mxu0 %v4171_v25  ;;  %v766_v26 = vpop.f32.mrf.mxu1 }
 0x19d   : > { %v767_v28 = vadd.f32 %v3994_v57, %v766_v26 }
 0x19f   : > { %805 = vmatmul.bf16.gmra.mxu1 %v653_v27  ;;  %v825_v36 = vmax.f32 %v767_v28, 0.0 }
 0x1a4   : > { %v768_v33 = vpop.f32.mrf.mxu1 }
 0x1a5   : > { %v769_v35 = vadd.f32 %v3994_v57, %v768_v33 }
 0x1a7   : > { %v826_v37 = vmax.f32 %v769_v35, 0.0 }
 0x1a9   : > { %v4184_v38 = vpack.c.bf16 %v826_v37, %v825_v36 }
 0x1ab   : > { %1270 = vmatmul.bf16.gmra.mxu2 %v4184_v38  ;;  %1359 = vmatmul.bf16.gmra.mxu3 %v4184_v38 }
 0x1ac   : > { %1448 = vmatmul.bf16.gmra.mxu0 %v4184_v38  ;;  %v771_v41 = vpop.f32.mrf.mxu1 }
 0x1ad   : > { %v772_v43 = vadd.f32 %v3994_v57, %v771_v41 }
 0x1af   : > { %1502 = vmatmul.bf16.vlgmr.msra.gmra.mxu1 %v4012_v10  ;;  %v827_v53 = vmax.f32 %v772_v43, 0.0 }
 0x1b4   : > { %v773_v48 = vpop.f32.mrf.mxu1 }
 0x1b5   : > { %v774_v50 = vadd.f32 %v3994_v57, %v773_v48 }
 0x1b7   : > { %v828_v54 = vmax.f32 %v774_v50, 0.0  ;;  %v2872_v50 = vld [vmem:[%s5040_s5 + $0x98] sm:$0xf0] }
 0x1b9   : > { %v4212_v55 = vpack.c.bf16 %v828_v54, %v827_v53  ;;  %v1414_v56 = vpop.f32.mrf.mxu0  ;;  %v2694_v54 = vor.u32 %v2872_v50, %v2693_v49  ;;  %v2701_v50 = vld [vmem:[%s5040_s5 + $0x88] sm:$0xf] }
 0x1ba   : > { %v1415_v58 = vadd.f32 %v1414_v56, %v4210_v52 }
 0x1bb   : > { %1275 = vmatmul.bf16.gmra.mxu2 %v4212_v55  ;;  %1364 = vmatmul.bf16.gmra.mxu3 %v4212_v55 }
 0x1bc   : > { %2985 = vtanh.f32 %v1415_v58  ;;  %1453 = vmatmul.bf16.gmra.mxu0 %v4212_v55  ;;  %v776_v62 = vpop.f32.mrf.mxu1  ;;  %1588 = vmatpush.bf16.msra.mxu2 %v2694_v54 }
 0x1bd   : > { %v777_v8 = vadd.f32 %v3994_v57, %v776_v62 }
 0x1be   : > { %v1236_v63 = vpop.f32.mrf.mxu2  ;;  %v1325_v0 = vpop.f32.mrf.mxu3 }
 0x1bf   : > { %v1237_v1 = vadd.f32 %v1236_v63, %v4218_v59  ;;  %v1326_v2 = vadd.f32 %v1325_v0, %v4221_v61  ;;  %1507 = vmatmul.bf16.gmra.mxu1 %v4036_v30  ;;  %v829_v18 = vmax.f32 %v777_v8, 0.0 }
 0x1c1   : > { %2987 = vtanh.f32 %v1237_v1  ;;  %v1416_v4 = vpop.f32.mrf.mxu0 }
 0x1c2   : > { %v2986_v5 = vpop.eup %2985  ;;  %2989 = vtanh.f32 %v1326_v2  ;;  %v1417_v6 = vadd.f32 %v1416_v4, %v4210_v52 }
 0x1c3   : > { %2076 = vst [vmem:[%s4231_s23 + $0x10] sm:$0xff] %v2986_v5 }
 0x1c4   : > { %2991 = vtanh.f32 %v1417_v6  ;;  %v778_v12 = vpop.f32.mrf.mxu1 }
 0x1c5   : > { %v779_v14 = vadd.f32 %v3994_v57, %v778_v12 }
 0x1c6   : > { %v1238_v15 = vpop.f32.mrf.mxu2  ;;  %v1327_v16 = vpop.f32.mrf.mxu3 }
 0x1c7   : > { %v2988_v17 = vpop.eup %2987  ;;  %v830_v20 = vmax.f32 %v779_v14, 0.0  ;;  %v1239_v21 = vadd.f32 %v1238_v15, %v4218_v59  ;;  %v1328_v22 = vadd.f32 %v1327_v16, %v4221_v61 }
 0x1c8   : > { %v2990_v23 = vpop.eup %2989  ;;  %2074 = vst [vmem:[%s4231_s23] sm:$0xff] %v2988_v17 }
 0x1c9   : > { %2075 = vst [vmem:[%s4231_s23 + $0x8] sm:$0xff] %v2990_v23  ;;  %v4247_v24 = vpack.c.bf16 %v830_v20, %v829_v18  ;;  %2993 = vtanh.f32 %v1239_v21  ;;  %v1419_v26 = vpop.f32.mrf.mxu0 }
 0x1ca   : > { %v2992_v27 = vpop.eup %2991  ;;  %2995 = vtanh.f32 %v1328_v22  ;;  %v1420_v28 = vadd.f32 %v1419_v26, %v4210_v52  ;;  %v2862_v26 = vld [vmem:[%s5040_s5 + $0x4c] sm:$0xf] }
 0x1cb   : > { %2084 = vst [vmem:[%s4231_s23 + $0x48] sm:$0xff] %v2992_v27  ;;  %1280 = vmatmul.bf16.gmra.mxu2 %v4247_v24  ;;  %1369 = vmatmul.bf16.gmra.mxu3 %v4247_v24  ;;  %v2667_v27 = vld [vmem:[%s5040_s5 + $0x64] sm:$0xf0] }
 0x1cc   : > { %2997 = vtanh.f32 %v1420_v28  ;;  %1458 = vmatmul.bf16.gmra.mxu0 %v4247_v24  ;;  %v781_v33 = vpop.f32.mrf.mxu1  ;;  %v2670_v32 = vor.u32 %v2862_v26, %v2667_v27 }
 0x1cd   : > { %v782_v48 = vadd.f32 %v3994_v57, %v781_v33 }
 0x1ce   : > { %v1241_v35 = vpop.f32.mrf.mxu2  ;;  %v1330_v36 = vpop.f32.mrf.mxu3  ;;  %1678 = vmatpush.bf16.msra.mxu3 %v2670_v32 }
 0x1cf   : > { %v2994_v37 = vpop.eup %2993  ;;  %v1242_v39 = vadd.f32 %v1241_v35, %v4218_v59  ;;  %v1331_v40 = vadd.f32 %v1330_v36, %v4221_v61  ;;  %1512 = vmatmul.bf16.gmra.mxu1 %v4057_v51  ;;  %v831_v0 = vmax.f32 %v782_v48, 0.0 }
 0x1d0   : > { %v2996_v41 = vpop.eup %2995  ;;  %2082 = vst [vmem:[%s4231_s23 + $0x38] sm:$0xff] %v2994_v37 }
 0x1d1   : > { %2083 = vst [vmem:[%s4231_s23 + $0x40] sm:$0xff] %v2996_v41  ;;  %2999 = vtanh.f32 %v1242_v39  ;;  %v1421_v43 = vpop.f32.mrf.mxu0 }
 0x1d2   : > { %v2998_v45 = vpop.eup %2997  ;;  %3001 = vtanh.f32 %v1331_v40  ;;  %v1422_v46 = vadd.f32 %v1421_v43, %v4210_v52 }
 0x1d3   : > { %2091 = vst [vmem:[%s4231_s23 + $0x80] sm:$0xff] %v2998_v45 }
 0x1d4   : > { %3003 = vtanh.f32 %v1422_v46  ;;  %v783_v53 = vpop.f32.mrf.mxu1 }
 0x1d5   : > { %v784_v56 = vadd.f32 %v3994_v57, %v783_v53  ;;  %v2873_v53 = vld [vmem:[%s5040_s5 + $0xa0] sm:$0xf0] }
 0x1d6   : > { %v1243_v58 = vpop.f32.mrf.mxu2  ;;  %v1332_v62 = vpop.f32.mrf.mxu3 }
 0x1d7   : > { %v3000_v63 = vpop.eup %2999  ;;  %v832_v1 = vmax.f32 %v784_v56, 0.0  ;;  %v1244_v2 = vadd.f32 %v1243_v58, %v4218_v59  ;;  %v1333_v4 = vadd.f32 %v1332_v62, %v4221_v61  ;;  %v4321_v56 = vor.u32 %v2873_v53, %v2701_v50  ;;  %v2855_v50 = vld [vmem:[%s5040_s5 + $0x14] sm:$0xf]  ;;  %v2639_v53 = vld [vmem:[%s5040_s5 + $0x2c] sm:$0xf0] }
 0x1d8   : > { %v3002_v5 = vpop.eup %3001  ;;  %2089 = vst [vmem:[%s4231_s23 + $0x70] sm:$0xff] %v3000_v63 }
 0x1d9   : > { %2090 = vst [vmem:[%s4231_s23 + $0x78] sm:$0xff] %v3002_v5  ;;  %v4282_v6 = vpack.c.bf16 %v832_v1, %v831_v0  ;;  %3005 = vtanh.f32 %v1244_v2  ;;  %v1424_v8 = vpop.f32.mrf.mxu0  ;;  %1766 = vmatpush.bf16.msra.mxu0 %v4321_v56 }
 0x1da   : > { %v3004_v9 = vpop.eup %3003  ;;  %3007 = vtanh.f32 %v1333_v4  ;;  %v1425_v11 = vadd.f32 %v1424_v8, %v4210_v52 }
 0x1db   : > { %2098 = vst [vmem:[%s4231_s23 + $0xb8] sm:$0xff] %v3004_v9  ;;  %1285 = vmatmul.bf16.gmra.mxu2 %v4282_v6  ;;  %1374 = vmatmul.bf16.gmra.mxu3 %v4282_v6 }
 0x1dc   : > { %3009 = vtanh.f32 %v1425_v11  ;;  %1463 = vmatmul.bf16.gmra.mxu0 %v4282_v6  ;;  %v786_v12 = vpop.f32.mrf.mxu1  ;;  %v2665_v11 = vld [vmem:[%s5040_s5 + $0x48] sm:$0xf] }
 0x1dd   : > { %v787_v23 = vadd.f32 %v3994_v57, %v786_v12  ;;  %v2865_v12 = vld [vmem:[%s5040_s5 + $0x60] sm:$0xf0] }
 0x1de   : > { %v1246_v13 = vpop.f32.mrf.mxu2  ;;  %v1335_v14 = vpop.f32.mrf.mxu3 }
 0x1df   : > { %v3006_v15 = vpop.eup %3005  ;;  %v1247_v16 = vadd.f32 %v1246_v13, %v4218_v59  ;;  %v1336_v17 = vadd.f32 %v1335_v14, %v4221_v61  ;;  %1517 = vmatmul.bf16.gmra.mxu1 %v4081_v7  ;;  %v833_v37 = vmax.f32 %v787_v23, 0.0  ;;  %v2666_v14 = vor.u32 %v2865_v12, %v2665_v11 }
 0x1e0   : > { %v3008_v18 = vpop.eup %3007  ;;  %2096 = vst [vmem:[%s4231_s23 + $0xa8] sm:$0xff] %v3006_v15 }
 0x1e1   : > { %2097 = vst [vmem:[%s4231_s23 + $0xb0] sm:$0xff] %v3008_v18  ;;  %3011 = vtanh.f32 %v1247_v16  ;;  %v1426_v20 = vpop.f32.mrf.mxu0  ;;  %1589 = vmatpush.bf16.msra.mxu2 %v2666_v14 }
 0x1e2   : > { %v3010_v21 = vpop.eup %3009  ;;  %3013 = vtanh.f32 %v1336_v17  ;;  %v1427_v22 = vadd.f32 %v1426_v20, %v4210_v52 }
 0x1e3   : > { %2105 = vst [vmem:[%s4231_s23 + $0xf0] sm:$0xff] %v3010_v21 }
 0x1e4   : > { %3015 = vtanh.f32 %v1427_v22  ;;  %v788_v28 = vpop.f32.mrf.mxu1 }
 0x1e5   : > { %v789_v29 = vadd.f32 %v3994_v57, %v788_v28 }
 0x1e6   : > { %v1248_v33 = vpop.f32.mrf.mxu2  ;;  %v1337_v35 = vpop.f32.mrf.mxu3 }
 0x1e7   : > { %v3012_v36 = vpop.eup %3011  ;;  %v834_v39 = vmax.f32 %v789_v29, 0.0  ;;  %v1249_v40 = vadd.f32 %v1248_v33, %v4218_v59  ;;  %v1338_v41 = vadd.f32 %v1337_v35, %v4221_v61 }
 0x1e8   : > { %v3014_v43 = vpop.eup %3013  ;;  %2103 = vst [vmem:[%s4231_s23 + $0xe0] sm:$0xff] %v3012_v36 }
 0x1e9   : > { %2104 = vst [vmem:[%s4231_s23 + $0xe8] sm:$0xff] %v3014_v43  ;;  %v4308_v45 = vpack.c.bf16 %v834_v39, %v833_v37  ;;  %3017 = vtanh.f32 %v1249_v40  ;;  %v1429_v46 = vpop.f32.mrf.mxu0 }
 0x1ea   : > { %v3016_v48 = vpop.eup %3015  ;;  %3019 = vtanh.f32 %v1338_v41  ;;  %v1430_v49 = vadd.f32 %v1429_v46, %v4210_v52 }
 0x1eb   : > { %2112 = vst [vmem:[%s4231_s23 + $0x128] sm:$0xff] %v3016_v48  ;;  %1290 = vmatmul.bf16.gmra.mxu2 %v4308_v45  ;;  %1379 = vmatmul.bf16.gmra.mxu3 %v4308_v45 }
 0x1ec   : > { %3021 = vtanh.f32 %v1430_v49  ;;  %1468 = vmatmul.bf16.gmra.mxu0 %v4308_v45  ;;  %v791_v54 = vpop.f32.mrf.mxu1 }
 0x1ed   : > { %v792_v9 = vadd.f32 %v3994_v57, %v791_v54 }
 0x1ee   : > { %v1251_v58 = vpop.f32.mrf.mxu2  ;;  %v1340_v62 = vpop.f32.mrf.mxu3 }
 0x1ef   : > { %v3018_v63 = vpop.eup %3017  ;;  %v1252_v0 = vadd.f32 %v1251_v58, %v4218_v59  ;;  %v1341_v1 = vadd.f32 %v1340_v62, %v4221_v61  ;;  %1522 = vmatmul.bf16.gmra.mxu1 %v4102_v31  ;;  %v835_v20 = vmax.f32 %v792_v9, 0.0  ;;  %v2642_v58 = vor.u32 %v2855_v50, %v2639_v53 }
 0x1f0   : > { %v3020_v2 = vpop.eup %3019  ;;  %2110 = vst [vmem:[%s4231_s23 + $0x118] sm:$0xff] %v3018_v63 }
 0x1f1   : > { %2111 = vst [vmem:[%s4231_s23 + $0x120] sm:$0xff] %v3020_v2  ;;  %3023 = vtanh.f32 %v1252_v0  ;;  %v1431_v4 = vpop.f32.mrf.mxu0  ;;  %1679 = vmatpush.bf16.msra.mxu3 %v2642_v58 }
 0x1f2   : > { %v3022_v5 = vpop.eup %3021  ;;  %3025 = vtanh.f32 %v1341_v1  ;;  %v1432_v8 = vadd.f32 %v1431_v4, %v4210_v52 }
 0x1f3   : > { %2119 = vst [vmem:[%s4231_s23 + $0x160] sm:$0xff] %v3022_v5 }
 0x1f4   : > { %3027 = vtanh.f32 %v1432_v8  ;;  %v793_v13 = vpop.f32.mrf.mxu1 }
 0x1f5   : > { %v794_v15 = vadd.f32 %v3994_v57, %v793_v13  ;;  %2912 = vmatpush.bf16.msrb.mxu3 %v4029_v19  ;;  %v2673_v19 = vld [vmem:[%s5040_s5 + $0x50] sm:$0xf] }
 0x1f6   : > { %v1253_v16 = vpop.f32.mrf.mxu2  ;;  %v1342_v17 = vpop.f32.mrf.mxu3 }
 0x1f7   : > { %v3024_v18 = vpop.eup %3023  ;;  %v836_v21 = vmax.f32 %v794_v15, 0.0  ;;  %v1254_v22 = vadd.f32 %v1253_v16, %v4218_v59  ;;  %v1343_v23 = vadd.f32 %v1342_v17, %v4221_v61  ;;  %v2866_v15 = vld [vmem:[%s5040_s5 + $0x68] sm:$0xf0] }
 0x1f8   : > { %v3026_v26 = vpop.eup %3025  ;;  %2117 = vst [vmem:[%s4231_s23 + $0x150] sm:$0xff] %v3024_v18  ;;  %v4383_v17 = vor.u32 %v2866_v15, %v2673_v19 }
 0x1f9   : > { %2118 = vst [vmem:[%s4231_s23 + $0x158] sm:$0xff] %v3026_v26  ;;  %v4343_v27 = vpack.c.bf16 %v836_v21, %v835_v20  ;;  %3029 = vtanh.f32 %v1254_v22  ;;  %v1434_v28 = vpop.f32.mrf.mxu0  ;;  %2913 = vmatpush.bf16.msrb.mxu3 %v4074_v60 }
 0x1fa   : > { %v3028_v32 = vpop.eup %3027  ;;  %3031 = vtanh.f32 %v1343_v23  ;;  %v1435_v29 = vadd.f32 %v1434_v28, %v4210_v52  ;;  %1767 = vmatpush.bf16.msra.mxu0 %v4383_v17 }
 0x1fb   : > { %2126 = vst [vmem:[%s4231_s23 + $0x198] sm:$0xff] %v3028_v32  ;;  %1295 = vmatmul.bf16.gmra.mxu2 %v4343_v27  ;;  %1384 = vmatmul.bf16.gmra.mxu3 %v4343_v27 }
 0x1fc   : > { %3033 = vtanh.f32 %v1435_v29  ;;  %1473 = vmatmul.bf16.gmra.mxu0 %v4343_v27  ;;  %v796_v33 = vpop.f32.mrf.mxu1 }
 0x1fd   : > { %v797_v49 = vadd.f32 %v3994_v57, %v796_v33  ;;  %2914 = vmatpush.bf16.msrb.mxu3 %v4131_v47 }
 0x1fe   : > { %v1256_v35 = vpop.f32.mrf.mxu2  ;;  %v1345_v36 = vpop.f32.mrf.mxu3 }
 0x1ff   : > { %v3030_v37 = vpop.eup %3029  ;;  %v1257_v39 = vadd.f32 %v1256_v35, %v4218_v59  ;;  %v1346_v40 = vadd.f32 %v1345_v36, %v4221_v61  ;;  %1527 = vmatmul.bf16.gmra.mxu1 %v4150_v3  ;;  %v837_v2 = vmax.f32 %v797_v49, 0.0  ;;  %v2859_v49 = vld [vmem:[%s5040_s5 + $0x30] sm:$0xf0] }
 0x200   : > { %v3032_v41 = vpop.eup %3031  ;;  %2124 = vst [vmem:[%s4231_s23 + $0x188] sm:$0xff] %v3030_v37 }
 0x201   : > { %2125 = vst [vmem:[%s4231_s23 + $0x190] sm:$0xff] %v3032_v41  ;;  %3035 = vtanh.f32 %v1257_v39  ;;  %v1436_v43 = vpop.f32.mrf.mxu0  ;;  %2915 = vmatpush.bf16.msrb.mxu3 %v4195_v42  ;;  %v2637_v39 = vld [vmem:[%s5040_s5 + $0x10] sm:$0xf]  ;;  %v2645_v41 = vld [vmem:[%s5040_s5 + $0x18] sm:$0xf] }
 0x202   : > { %v3034_v46 = vpop.eup %3033  ;;  %3037 = vtanh.f32 %v1346_v40  ;;  %v1437_v48 = vadd.f32 %v1436_v43, %v4210_v52  ;;  %v2858_v40 = vld [vmem:[%s5040_s5 + $0x28] sm:$0xf0]  ;;  %v2646_v53 = vor.u32 %v2859_v49, %v2645_v41 }
 0x203   : > { %2133 = vst [vmem:[%s4231_s23 + $0x1d0] sm:$0xff] %v3034_v46 }
 0x204   : > { %3039 = vtanh.f32 %v1437_v48  ;;  %v798_v54 = vpop.f32.mrf.mxu1  ;;  %v2638_v48 = vor.u32 %v2858_v40, %v2637_v39  ;;  %1768 = vmatpush.bf16.msra.mxu0 %v2646_v53 }
 0x205   : > { %v799_v62 = vadd.f32 %v3994_v57, %v798_v54  ;;  %2916 = vmatpush.bf16.msrb.mxu3 %v4260_v34 }
 0x206   : > { %v1258_v63 = vpop.f32.mrf.mxu2  ;;  %v1347_v0 = vpop.f32.mrf.mxu3  ;;  %1590 = vmatpush.bf16.msra.mxu2 %v2638_v48 }
 0x207   : > { %v3036_v1 = vpop.eup %3035  ;;  %v838_v4 = vmax.f32 %v799_v62, 0.0  ;;  %v1259_v5 = vadd.f32 %v1258_v63, %v4218_v59  ;;  %v1348_v8 = vadd.f32 %v1347_v0, %v4221_v61 }
 0x208   : > { %v3038_v9 = vpop.eup %3037  ;;  %2131 = vst [vmem:[%s4231_s23 + $0x1c0] sm:$0xff] %v3036_v1 }
 0x209   : > { %2132 = vst [vmem:[%s4231_s23 + $0x1c8] sm:$0xff] %v3038_v9  ;;  %v4370_v11 = vpack.c.bf16 %v838_v4, %v837_v2  ;;  %3041 = vtanh.f32 %v1259_v5  ;;  %v1439_v12 = vpop.f32.mrf.mxu0  ;;  %2917 = vmatpush.bf16.msrb.mxu3 %v4321_v56 }
 0x20a   : > { %v3040_v13 = vpop.eup %3039  ;;  %3043 = vtanh.f32 %v1348_v8  ;;  %v1440_v14 = vadd.f32 %v1439_v12, %v4210_v52 }
 0x20b   : > { %2140 = vst [vmem:[%s4231_s23 + $0x208] sm:$0xff] %v3040_v13  ;;  %1300 = vmatmul.bf16.gmra.mxu2 %v4370_v11  ;;  %1389 = vmatmul.bf16.gmra.mxu3 %v4370_v11  ;;  %v3433_v13 = vld [vmem:[#allocation7] ss:$0 sm:$0xff] }
 0x20c   : > { %3045 = vtanh.f32 %v1440_v14  ;;  %1478 = vmatmul.bf16.gmra.mxu0 %v4370_v11  ;;  %v801_v16 = vpop.f32.mrf.mxu1 }
 0x20d   : > { %v802_v28 = vadd.f32 %v3994_v57, %v801_v16  ;;  %2918 = vmatpush.bf16.msrb.mxu3 %v4383_v17 }
 0x20e   : > { %v1261_v18 = vpop.f32.mrf.mxu2  ;;  %v1350_v20 = vpop.f32.mrf.mxu3 }
 0x20f   : > { %v3042_v21 = vpop.eup %3041  ;;  %v1262_v22 = vadd.f32 %v1261_v18, %v4218_v59  ;;  %v1351_v23 = vadd.f32 %v1350_v20, %v4221_v61  ;;  %1532 = vmatmul.bf16.gmra.mxu1 %v4171_v25  ;;  %v839_v35 = vmax.f32 %v802_v28, 0.0 }
 0x210   : > { %v3044_v26 = vpop.eup %3043  ;;  %2138 = vst [vmem:[%s4231_s23 + $0x1f8] sm:$0xff] %v3042_v21 }
 0x211   : > { %2139 = vst [vmem:[%s4231_s23 + $0x200] sm:$0xff] %v3044_v26  ;;  %3047 = vtanh.f32 %v1262_v22  ;;  %v1441_v60 = vpop.f32.mrf.mxu0  ;;  %2919 = vmatpush.bf16.msrb.mxu3 %v2646_v53 }
 0x212   : > { %v3046_v32 = vpop.eup %3045  ;;  %3049 = vtanh.f32 %v1351_v23  ;;  %v1442_v29 = vadd.f32 %v1441_v60, %v4210_v52 }
 0x213   : > { %2147 = vst [vmem:[%s4231_s23 + $0x240] sm:$0xff] %v3046_v32  ;;  %v4438_v32 = vperm.slane %v4200_v44, 3 }
 0x214   : > { %3051 = vtanh.f32 %v1442_v29  ;;  %v803_v33 = vpop.f32.mrf.mxu1 }
 0x215   : > { %v804_v36 = vadd.f32 %v3994_v57, %v803_v33 }
 0x216   : > { %v1263_v47 = vpop.f32.mrf.mxu2  ;;  %v1352_v37 = vpop.f32.mrf.mxu3 }
 0x217   : > { %v3048_v43 = vpop.eup %3047  ;;  %v840_v42 = vmax.f32 %v804_v36, 0.0  ;;  %v1264_v46 = vadd.f32 %v1263_v47, %v4218_v59  ;;  %v1353_v57 = vadd.f32 %v1352_v37, %v4221_v61 }
 0x218   : > { %v3050_v50 = vpop.eup %3049  ;;  %2145 = vst [vmem:[%s4231_s23 + $0x230] sm:$0xff] %v3048_v43 }
 0x219   : > { %2146 = vst [vmem:[%s4231_s23 + $0x238] sm:$0xff] %v3050_v50  ;;  %v4415_v54 = vpack.c.bf16 %v840_v42, %v839_v35  ;;  %3053 = vtanh.f32 %v1264_v46  ;;  %v1444_v58 = vpop.f32.mrf.mxu0 }
 0x21a   : > { %v3052_v62 = vpop.eup %3051  ;;  %3055 = vtanh.f32 %v1353_v57  ;;  %v1445_v63 = vadd.f32 %v1444_v58, %v4210_v52 }
 0x21b   : > { %2154 = vst [vmem:[%s4231_s23 + $0x278] sm:$0xff] %v3052_v62  ;;  %1305 = vmatmul.bf16.gmra.mxu2 %v4415_v54  ;;  %1394 = vmatmul.bf16.gmra.mxu3 %v4415_v54 }
 0x21c   : > { %3057 = vtanh.f32 %v1445_v63  ;;  %1483 = vmatmul.bf16.gmra.mxu0 %v4415_v54  ;;  %v806_v34 = vpop.f32.mrf.mxu1 }
 0x21d   : > { %v807_v14 = vadd.f32 %v3433_v13, %v806_v34 }
 0x21e   : > { %v1266_v0 = vpop.f32.mrf.mxu2  ;;  %v1355_v1 = vpop.f32.mrf.mxu3 }
 0x21f   : > { %v3054_v2 = vpop.eup %3053  ;;  %v1267_v4 = vadd.f32 %v1266_v0, %v4218_v59  ;;  %v1356_v5 = vadd.f32 %v1355_v1, %v4221_v61  ;;  %1537 = vmatmul.bf16.gmra.mxu1 %v4184_v38  ;;  %v841_v20 = vmax.f32 %v807_v14, 0.0 }
 0x220   : > { %v3056_v8 = vpop.eup %3055  ;;  %2152 = vst [vmem:[%s4231_s23 + $0x268] sm:$0xff] %v3054_v2 }
 0x221   : > { %2153 = vst [vmem:[%s4231_s23 + $0x270] sm:$0xff] %v3056_v8  ;;  %3059 = vtanh.f32 %v1267_v4  ;;  %v1446_v9 = vpop.f32.mrf.mxu0 }
 0x222   : > { %v3058_v12 = vpop.eup %3057  ;;  %3061 = vtanh.f32 %v1356_v5  ;;  %v1447_v56 = vadd.f32 %v1446_v9, %v4210_v52 }
 0x223   : > { %2161 = vst [vmem:[%s4231_s23 + $0x2b0] sm:$0xff] %v3058_v12 }
 0x224   : > { %3063 = vtanh.f32 %v1447_v56  ;;  %v808_v19 = vpop.f32.mrf.mxu1 }
 0x225   : > { %v809_v15 = vadd.f32 %v3433_v13, %v808_v19 }
 0x226   : > { %v1268_v16 = vpop.f32.mrf.mxu2  ;;  %v1357_v18 = vpop.f32.mrf.mxu3 }
 0x227   : > { %v3060_v17 = vpop.eup %3059  ;;  %v842_v21 = vmax.f32 %v809_v15, 0.0  ;;  %v1269_v22 = vadd.f32 %v1268_v16, %v4218_v59  ;;  %v1358_v23 = vadd.f32 %v1357_v18, %v4221_v61 }
 0x228   : > { %v3062_v26 = vpop.eup %3061  ;;  %2159 = vst [vmem:[%s4231_s23 + $0x2a0] sm:$0xff] %v3060_v17 }
 0x229   : > { %2160 = vst [vmem:[%s4231_s23 + $0x2a8] sm:$0xff] %v3062_v26  ;;  %v4435_v28 = vpack.c.bf16 %v842_v21, %v841_v20  ;;  %3065 = vtanh.f32 %v1269_v22  ;;  %v1449_v60 = vpop.f32.mrf.mxu0 }
 0x22a   : > { %v3064_v29 = vpop.eup %3063  ;;  %3067 = vtanh.f32 %v1358_v23  ;;  %v1450_v33 = vadd.f32 %v1449_v60, %v4210_v52 }
 0x22b   : > { %2168 = vst [vmem:[%s4231_s23 + $0x2e8] sm:$0xff] %v3064_v29  ;;  %1310 = vmatmul.bf16.gmra.mxu2 %v4435_v28  ;;  %1399 = vmatmul.bf16.gmra.mxu3 %v4435_v28 }
 0x22c   : > { %3069 = vtanh.f32 %v1450_v33  ;;  %1488 = vmatmul.bf16.gmra.mxu0 %v4435_v28  ;;  %v1503_v35 = vpop.f32.mrf.mxu1 }
 0x22d   : > { %v1504_v36 = vadd.f32 %v1503_v35, %v4438_v32 }
 0x22e   : > { %v1271_v44 = vpop.f32.mrf.mxu2  ;;  %v1360_v47 = vpop.f32.mrf.mxu3 }
 0x22f   : > { %v3066_v37 = vpop.eup %3065  ;;  %3071 = vtanh.f32 %v1504_v36  ;;  %v1272_v39 = vadd.f32 %v1271_v44, %v4218_v59  ;;  %v1361_v40 = vadd.f32 %v1360_v47, %v4221_v61  ;;  %1542 = vmatmul.bf16.gmra.mxu1 %v4212_v55 }
 0x230   : > { %v3068_v41 = vpop.eup %3067  ;;  %2166 = vst [vmem:[%s4231_s23 + $0x2d8] sm:$0xff] %v3066_v37 }
 0x231   : > { %2167 = vst [vmem:[%s4231_s23 + $0x2e0] sm:$0xff] %v3068_v41  ;;  %3073 = vtanh.f32 %v1272_v39  ;;  %v1451_v43 = vpop.f32.mrf.mxu0 }
 0x232   : > { %v3070_v42 = vpop.eup %3069  ;;  %3075 = vtanh.f32 %v1361_v40  ;;  %v1452_v46 = vadd.f32 %v1451_v43, %v4210_v52 }
 0x233   : > { %2175 = vst [vmem:[%s4231_s23 + $0x320] sm:$0xff] %v3070_v42 }
 0x234   : > { %3077 = vtanh.f32 %v1452_v46  ;;  %v1505_v57 = vpop.f32.mrf.mxu1 }
 0x235   : > { %v3072_v48 = vpop.eup %3071  ;;  %v1506_v49 = vadd.f32 %v1505_v57, %v4438_v32 }
 0x236   : > { %2077 = vst [vmem:[%s4231_s23 + $0x18] sm:$0xff] %v3072_v48  ;;  %v1273_v50 = vpop.f32.mrf.mxu2  ;;  %v1362_v53 = vpop.f32.mrf.mxu3 }
 0x237   : > { %v3074_v58 = vpop.eup %3073  ;;  %3079 = vtanh.f32 %v1506_v49  ;;  %v1274_v62 = vadd.f32 %v1273_v50, %v4218_v59  ;;  %v1363_v63 = vadd.f32 %v1362_v53, %v4221_v61 }
 0x238   : > { %v3076_v34 = vpop.eup %3075  ;;  %2173 = vst [vmem:[%s4231_s23 + $0x310] sm:$0xff] %v3074_v58 }
 0x239   : > { %2174 = vst [vmem:[%s4231_s23 + $0x318] sm:$0xff] %v3076_v34  ;;  %3081 = vtanh.f32 %v1274_v62  ;;  %v1454_v0 = vpop.f32.mrf.mxu0 }
 0x23a   : > { %v3078_v1 = vpop.eup %3077  ;;  %3083 = vtanh.f32 %v1363_v63  ;;  %v1455_v2 = vadd.f32 %v1454_v0, %v4210_v52 }
 0x23b   : > { %2182 = vst [vmem:[%s4231_s23 + $0x358] sm:$0xff] %v3078_v1  ;;  %1591 = vmatmul.bf16.vlgmr.msra.gmra.mxu2 %v4012_v10  ;;  %1680 = vmatmul.bf16.vlgmr.msra.gmra.mxu3 %v4012_v10 }
 0x23c   : > { %3085 = vtanh.f32 %v1455_v2  ;;  %1769 = vmatmul.bf16.vlgmr.msra.gmra.mxu0 %v4012_v10  ;;  %v1508_v4 = vpop.f32.mrf.mxu1 }
 0x23d   : > { %v3080_v5 = vpop.eup %3079  ;;  %v1509_v8 = vadd.f32 %v1508_v4, %v4438_v32 }
 0x23e   : > { %2085 = vst [vmem:[%s4231_s23 + $0x50] sm:$0xff] %v3080_v5  ;;  %v1276_v9 = vpop.f32.mrf.mxu2  ;;  %v1365_v12 = vpop.f32.mrf.mxu3 }
 0x23f   : > { %v3082_v56 = vpop.eup %3081  ;;  %3087 = vtanh.f32 %v1509_v8  ;;  %v1277_v13 = vadd.f32 %v1276_v9, %v4218_v59  ;;  %v1366_v14 = vadd.f32 %v1365_v12, %v4221_v61  ;;  %1547 = vmatmul.bf16.gmra.mxu1 %v4247_v24 }
 0x240   : > { %v3084_v19 = vpop.eup %3083  ;;  %2180 = vst [vmem:[%s4231_s23 + $0x348] sm:$0xff] %v3082_v56 }
 0x241   : > { %2181 = vst [vmem:[%s4231_s23 + $0x350] sm:$0xff] %v3084_v19  ;;  %3089 = vtanh.f32 %v1277_v13  ;;  %v1456_v10 = vpop.f32.mrf.mxu0 }
 0x242   : > { %v3086_v15 = vpop.eup %3085  ;;  %3091 = vtanh.f32 %v1366_v14  ;;  %v1457_v16 = vadd.f32 %v1456_v10, %v4210_v52 }
 0x243   : > { %2189 = vst [vmem:[%s4231_s23 + $0x390] sm:$0xff] %v3086_v15 }
 0x244   : > { %3093 = vtanh.f32 %v1457_v16  ;;  %v1510_v18 = vpop.f32.mrf.mxu1 }
 0x245   : > { %v3088_v17 = vpop.eup %3087  ;;  %v1511_v20 = vadd.f32 %v1510_v18, %v4438_v32 }
 0x246   : > { %2092 = vst [vmem:[%s4231_s23 + $0x88] sm:$0xff] %v3088_v17  ;;  %v1278_v21 = vpop.f32.mrf.mxu2  ;;  %v1367_v22 = vpop.f32.mrf.mxu3 }
 0x247   : > { %v3090_v23 = vpop.eup %3089  ;;  %3095 = vtanh.f32 %v1511_v20  ;;  %v1279_v26 = vadd.f32 %v1278_v21, %v4218_v59  ;;  %v1368_v60 = vadd.f32 %v1367_v22, %v4221_v61 }
 0x248   : > { %v3092_v29 = vpop.eup %3091  ;;  %2187 = vst [vmem:[%s4231_s23 + $0x380] sm:$0xff] %v3090_v23 }
 0x249   : > { %2188 = vst [vmem:[%s4231_s23 + $0x388] sm:$0xff] %v3092_v29  ;;  %3097 = vtanh.f32 %v1279_v26  ;;  %v1459_v33 = vpop.f32.mrf.mxu0 }
 0x24a   : > { %v3094_v35 = vpop.eup %3093  ;;  %3099 = vtanh.f32 %v1368_v60  ;;  %v1460_v36 = vadd.f32 %v1459_v33, %v4210_v52 }
 0x24b   : > { %2196 = vst [vmem:[%s4231_s23 + $0x3c8] sm:$0xff] %v3094_v35  ;;  %1596 = vmatmul.bf16.gmra.mxu2 %v4036_v30  ;;  %1685 = vmatmul.bf16.gmra.mxu3 %v4036_v30 }
 0x24c   : > { %3101 = vtanh.f32 %v1460_v36  ;;  %1774 = vmatmul.bf16.gmra.mxu0 %v4036_v30  ;;  %v1513_v44 = vpop.f32.mrf.mxu1 }
 0x24d   : > { %v3096_v47 = vpop.eup %3095  ;;  %v1514_v37 = vadd.f32 %v1513_v44, %v4438_v32 }
 0x24e   : > { %2099 = vst [vmem:[%s4231_s23 + $0xc0] sm:$0xff] %v3096_v47  ;;  %v1281_v39 = vpop.f32.mrf.mxu2  ;;  %v1370_v40 = vpop.f32.mrf.mxu3 }
 0x24f   : > { %v3098_v41 = vpop.eup %3097  ;;  %3103 = vtanh.f32 %v1514_v37  ;;  %v1282_v43 = vadd.f32 %v1281_v39, %v4218_v59  ;;  %v1371_v42 = vadd.f32 %v1370_v40, %v4221_v61  ;;  %1552 = vmatmul.bf16.gmra.mxu1 %v4282_v6 }
 0x250   : > { %v3100_v46 = vpop.eup %3099  ;;  %2194 = vst [vmem:[%s4231_s23 + $0x3b8] sm:$0xff] %v3098_v41 }
 0x251   : > { %2195 = vst [vmem:[%s4231_s23 + $0x3c0] sm:$0xff] %v3100_v46  ;;  %3105 = vtanh.f32 %v1282_v43  ;;  %v1461_v30 = vpop.f32.mrf.mxu0 }
 0x252   : > { %v3102_v57 = vpop.eup %3101  ;;  %3107 = vtanh.f32 %v1371_v42  ;;  %v1462_v48 = vadd.f32 %v1461_v30, %v4210_v52 }
 0x253   : > { %2203 = vst [vmem:[%s4231_s23 + $0x400] sm:$0xff] %v3102_v57 }
 0x254   : > { %3109 = vtanh.f32 %v1462_v48  ;;  %v1515_v49 = vpop.f32.mrf.mxu1 }
 0x255   : > { %v3104_v50 = vpop.eup %3103  ;;  %v1516_v53 = vadd.f32 %v1515_v49, %v4438_v32 }
 0x256   : > { %2106 = vst [vmem:[%s4231_s23 + $0xf8] sm:$0xff] %v3104_v50  ;;  %v1283_v58 = vpop.f32.mrf.mxu2  ;;  %v1372_v62 = vpop.f32.mrf.mxu3 }
 0x257   : > { %v3106_v63 = vpop.eup %3105  ;;  %3111 = vtanh.f32 %v1516_v53  ;;  %v1284_v34 = vadd.f32 %v1283_v58, %v4218_v59  ;;  %v1373_v0 = vadd.f32 %v1372_v62, %v4221_v61 }
 0x258   : > { %v3108_v1 = vpop.eup %3107  ;;  %2201 = vst [vmem:[%s4231_s23 + $0x3f0] sm:$0xff] %v3106_v63 }
 0x259   : > { %2202 = vst [vmem:[%s4231_s23 + $0x3f8] sm:$0xff] %v3108_v1  ;;  %3113 = vtanh.f32 %v1284_v34  ;;  %v1464_v2 = vpop.f32.mrf.mxu0 }
 0x25a   : > { %v3110_v4 = vpop.eup %3109  ;;  %3115 = vtanh.f32 %v1373_v0  ;;  %v1465_v5 = vadd.f32 %v1464_v2, %v4210_v52 }
 0x25b   : > { %2210 = vst [vmem:[%s4231_s23 + $0x438] sm:$0xff] %v3110_v4  ;;  %1601 = vmatmul.bf16.gmra.mxu2 %v4057_v51  ;;  %1690 = vmatmul.bf16.gmra.mxu3 %v4057_v51 }
 0x25c   : > { %3117 = vtanh.f32 %v1465_v5  ;;  %1779 = vmatmul.bf16.gmra.mxu0 %v4057_v51  ;;  %v1518_v8 = vpop.f32.mrf.mxu1 }
 0x25d   : > { %v3112_v9 = vpop.eup %3111  ;;  %v1519_v12 = vadd.f32 %v1518_v8, %v4438_v32 }
 0x25e   : > { %2113 = vst [vmem:[%s4231_s23 + $0x130] sm:$0xff] %v3112_v9  ;;  %v1286_v56 = vpop.f32.mrf.mxu2  ;;  %v1375_v13 = vpop.f32.mrf.mxu3 }
 0x25f   : > { %v3114_v14 = vpop.eup %3113  ;;  %3119 = vtanh.f32 %v1519_v12  ;;  %v1287_v19 = vadd.f32 %v1286_v56, %v4218_v59  ;;  %v1376_v10 = vadd.f32 %v1375_v13, %v4221_v61  ;;  %1557 = vmatmul.bf16.gmra.mxu1 %v4308_v45 }
 0x260   : > { %v3116_v15 = vpop.eup %3115  ;;  %2208 = vst [vmem:[%s4231_s23 + $0x428] sm:$0xff] %v3114_v14 }
 0x261   : > { %2209 = vst [vmem:[%s4231_s23 + $0x430] sm:$0xff] %v3116_v15  ;;  %3121 = vtanh.f32 %v1287_v19  ;;  %v1466_v51 = vpop.f32.mrf.mxu0 }
 0x262   : > { %v3118_v16 = vpop.eup %3117  ;;  %3123 = vtanh.f32 %v1376_v10  ;;  %v1467_v18 = vadd.f32 %v1466_v51, %v4210_v52 }
 0x263   : > { %2217 = vst [vmem:[%s4231_s23 + $0x470] sm:$0xff] %v3118_v16 }
 0x264   : > { %3125 = vtanh.f32 %v1467_v18  ;;  %v1520_v17 = vpop.f32.mrf.mxu1 }
 0x265   : > { %v3120_v20 = vpop.eup %3119  ;;  %v1521_v21 = vadd.f32 %v1520_v17, %v4438_v32 }
 0x266   : > { %2120 = vst [vmem:[%s4231_s23 + $0x168] sm:$0xff] %v3120_v20  ;;  %v1288_v22 = vpop.f32.mrf.mxu2  ;;  %v1377_v23 = vpop.f32.mrf.mxu3 }
 0x267   : > { %v3122_v26 = vpop.eup %3121  ;;  %3127 = vtanh.f32 %v1521_v21  ;;  %v1289_v60 = vadd.f32 %v1288_v22, %v4218_v59  ;;  %v1378_v29 = vadd.f32 %v1377_v23, %v4221_v61 }
 0x268   : > { %v3124_v33 = vpop.eup %3123  ;;  %2215 = vst [vmem:[%s4231_s23 + $0x460] sm:$0xff] %v3122_v26 }
 0x269   : > { %2216 = vst [vmem:[%s4231_s23 + $0x468] sm:$0xff] %v3124_v33  ;;  %3129 = vtanh.f32 %v1289_v60  ;;  %v1469_v35 = vpop.f32.mrf.mxu0 }
 0x26a   : > { %v3126_v36 = vpop.eup %3125  ;;  %3131 = vtanh.f32 %v1378_v29  ;;  %v1470_v44 = vadd.f32 %v1469_v35, %v4210_v52 }
 0x26b   : > { %2224 = vst [vmem:[%s4231_s23 + $0x4a8] sm:$0xff] %v3126_v36  ;;  %1606 = vmatmul.bf16.gmra.mxu2 %v4081_v7  ;;  %1695 = vmatmul.bf16.gmra.mxu3 %v4081_v7 }
 0x26c   : > { %3133 = vtanh.f32 %v1470_v44  ;;  %1784 = vmatmul.bf16.gmra.mxu0 %v4081_v7  ;;  %v1523_v47 = vpop.f32.mrf.mxu1 }
 0x26d   : > { %v3128_v37 = vpop.eup %3127  ;;  %v1524_v39 = vadd.f32 %v1523_v47, %v4438_v32 }
 0x26e   : > { %2127 = vst [vmem:[%s4231_s23 + $0x1a0] sm:$0xff] %v3128_v37  ;;  %v1291_v40 = vpop.f32.mrf.mxu2  ;;  %v1380_v41 = vpop.f32.mrf.mxu3 }
 0x26f   : > { %v3130_v43 = vpop.eup %3129  ;;  %3135 = vtanh.f32 %v1524_v39  ;;  %v1292_v42 = vadd.f32 %v1291_v40, %v4218_v59  ;;  %v1381_v46 = vadd.f32 %v1380_v41, %v4221_v61  ;;  %1562 = vmatmul.bf16.gmra.mxu1 %v4343_v27 }
 0x270   : > { %v3132_v30 = vpop.eup %3131  ;;  %2222 = vst [vmem:[%s4231_s23 + $0x498] sm:$0xff] %v3130_v43 }
 0x271   : > { %2223 = vst [vmem:[%s4231_s23 + $0x4a0] sm:$0xff] %v3132_v30  ;;  %3137 = vtanh.f32 %v1292_v42  ;;  %v1471_v7 = vpop.f32.mrf.mxu0  ;;  %v3435_v30 = vld [vmem:[%s3758_s17] sm:$0xff] }
 0x272   : > { %v3134_v57 = vpop.eup %3133  ;;  %3139 = vtanh.f32 %v1381_v46  ;;  %v1472_v48 = vadd.f32 %v1471_v7, %v4210_v52  ;;  %2299 = vrot.lane.b32.xlu0 %v3435_v30, %s3644_s30  ;;  %v3436_v7 = vld [vmem:[%s3758_s17 + $0x20] sm:$0xff] }
 0x273   : > { %2231 = vst [vmem:[%s4231_s23 + $0x4e0] sm:$0xff] %v3134_v57  ;;  %2307 = vrot.lane.b32.xlu2 %v3436_v7, %s3644_s30 }
 0x274   : > { %3141 = vtanh.f32 %v1472_v48  ;;  %v1525_v49 = vpop.f32.mrf.mxu1 }
 0x275   : > { %v3136_v50 = vpop.eup %3135  ;;  %v1526_v53 = vadd.f32 %v1525_v49, %v4438_v32 }
 0x276   : > { %2134 = vst [vmem:[%s4231_s23 + $0x1d8] sm:$0xff] %v3136_v50  ;;  %v1293_v58 = vpop.f32.mrf.mxu2  ;;  %v1382_v62 = vpop.f32.mrf.mxu3 }
 0x277   : > { %v3138_v63 = vpop.eup %3137  ;;  %3143 = vtanh.f32 %v1526_v53  ;;  %v1294_v34 = vadd.f32 %v1293_v58, %v4218_v59  ;;  %v1383_v0 = vadd.f32 %v1382_v62, %v4221_v61 }
 0x278   : > { %v3140_v1 = vpop.eup %3139  ;;  %2229 = vst [vmem:[%s4231_s23 + $0x4d0] sm:$0xff] %v3138_v63 }
 0x279   : > { %2230 = vst [vmem:[%s4231_s23 + $0x4d8] sm:$0xff] %v3140_v1  ;;  %3145 = vtanh.f32 %v1294_v34  ;;  %v1474_v2 = vpop.f32.mrf.mxu0 }
 0x27a   : > { %v3142_v4 = vpop.eup %3141  ;;  %3147 = vtanh.f32 %v1383_v0  ;;  %v1475_v5 = vadd.f32 %v1474_v2, %v4210_v52  ;;  %v3437_v2 = vld [vmem:[%s3758_s17 + $0x18] sm:$0xff] }
 0x27b   : > { %2238 = vst [vmem:[%s4231_s23 + $0x518] sm:$0xff] %v3142_v4  ;;  %1611 = vmatmul.bf16.gmra.mxu2 %v4102_v31  ;;  %1700 = vmatmul.bf16.gmra.mxu3 %v4102_v31 }
 0x27c   : > { %3149 = vtanh.f32 %v1475_v5  ;;  %1789 = vmatmul.bf16.gmra.mxu0 %v4102_v31  ;;  %v1528_v8 = vpop.f32.mrf.mxu1  ;;  %v3438_v5 = vld [vmem:[%s3758_s17 + $0x8] sm:$0xff] }
 0x27d   : > { %v3144_v9 = vpop.eup %3143  ;;  %v1529_v12 = vadd.f32 %v1528_v8, %v4438_v32  ;;  %2301 = vrot.lane.b32.xlu0 %v3438_v5, %s3644_s30  ;;  %v3439_v8 = vld [vmem:[%s3758_s17 + $0x28] sm:$0xff] }
 0x27e   : > { %2141 = vst [vmem:[%s4231_s23 + $0x210] sm:$0xff] %v3144_v9  ;;  %v1296_v56 = vpop.f32.mrf.mxu2  ;;  %v1385_v13 = vpop.f32.mrf.mxu3  ;;  %2309 = vrot.lane.b32.xlu2 %v3439_v8, %s3644_s30 }
 0x27f   : > { %v3146_v14 = vpop.eup %3145  ;;  %3151 = vtanh.f32 %v1529_v12  ;;  %v1297_v19 = vadd.f32 %v1296_v56, %v4218_v59  ;;  %v1386_v10 = vadd.f32 %v1385_v13, %v4221_v61  ;;  %1567 = vmatmul.bf16.gmra.mxu1 %v4370_v11 }
 0x280   : > { %v3148_v15 = vpop.eup %3147  ;;  %2236 = vst [vmem:[%s4231_s23 + $0x508] sm:$0xff] %v3146_v14 }
 0x281   : > { %2237 = vst [vmem:[%s4231_s23 + $0x510] sm:$0xff] %v3148_v15  ;;  %3153 = vtanh.f32 %v1297_v19  ;;  %v1476_v31 = vpop.f32.mrf.mxu0 }
 0x282   : > { %v3150_v51 = vpop.eup %3149  ;;  %3155 = vtanh.f32 %v1386_v10  ;;  %v1477_v16 = vadd.f32 %v1476_v31, %v4210_v52 }
 0x283   : > { %2245 = vst [vmem:[%s4231_s23 + $0x550] sm:$0xff] %v3150_v51 }
 0x284   : > { %3157 = vtanh.f32 %v1477_v16  ;;  %v1530_v18 = vpop.f32.mrf.mxu1 }
 0x285   : > { %v3152_v17 = vpop.eup %3151  ;;  %v1531_v20 = vadd.f32 %v1530_v18, %v4438_v32 }
 0x286   : > { %2148 = vst [vmem:[%s4231_s23 + $0x248] sm:$0xff] %v3152_v17  ;;  %v1298_v21 = vpop.f32.mrf.mxu2  ;;  %v1387_v22 = vpop.f32.mrf.mxu3  ;;  %v3441_v17 = vld [vmem:[%s3758_s17 + $0x30] sm:$0xff] }
 0x287   : > { %v3154_v23 = vpop.eup %3153  ;;  %3159 = vtanh.f32 %v1531_v20  ;;  %v1299_v26 = vadd.f32 %v1298_v21, %v4218_v59  ;;  %v1388_v60 = vadd.f32 %v1387_v22, %v4221_v61  ;;  %2311 = vrot.lane.b32.xlu0 %v3441_v17, %s3644_s30  ;;  %v3442_v20 = vld [vmem:[%s3758_s17 + $0x40] sm:$0xff] }
 0x288   : > { %v3156_v29 = vpop.eup %3155  ;;  %2243 = vst [vmem:[%s4231_s23 + $0x540] sm:$0xff] %v3154_v23  ;;  %2315 = vrot.lane.b32.xlu2 %v3442_v20, %s3644_s30 }
 0x289   : > { %2244 = vst [vmem:[%s4231_s23 + $0x548] sm:$0xff] %v3156_v29  ;;  %3161 = vtanh.f32 %v1299_v26  ;;  %v1479_v33 = vpop.f32.mrf.mxu0 }
 0x28a   : > { %v3158_v35 = vpop.eup %3157  ;;  %3163 = vtanh.f32 %v1388_v60  ;;  %v1480_v36 = vadd.f32 %v1479_v33, %v4210_v52 }
 0x28b   : > { %2252 = vst [vmem:[%s4231_s23 + $0x588] sm:$0xff] %v3158_v35  ;;  %1616 = vmatmul.bf16.gmra.mxu2 %v4150_v3  ;;  %1705 = vmatmul.bf16.gmra.mxu3 %v4150_v3 }
 0x28c   : > { %3165 = vtanh.f32 %v1480_v36  ;;  %1794 = vmatmul.bf16.gmra.mxu0 %v4150_v3  ;;  %v1533_v44 = vpop.f32.mrf.mxu1  ;;  %v3434_v3 = vld [vmem:[%s3758_s17 + $0x10] sm:$0xff] }
 0x28d   : > { %v3160_v47 = vpop.eup %3159  ;;  %v1534_v37 = vadd.f32 %v1533_v44, %v4438_v32  ;;  %2303 = vrot.lane.b32.xlu1 %v3434_v3, %s3644_s30 }
 0x28e   : > { %2155 = vst [vmem:[%s4231_s23 + $0x280] sm:$0xff] %v3160_v47  ;;  %v1301_v39 = vpop.f32.mrf.mxu2  ;;  %v1390_v40 = vpop.f32.mrf.mxu3 }
 0x28f   : > { %v3162_v41 = vpop.eup %3161  ;;  %3167 = vtanh.f32 %v1534_v37  ;;  %v1302_v43 = vadd.f32 %v1301_v39, %v4218_v59  ;;  %v1391_v42 = vadd.f32 %v1390_v40, %v4221_v61  ;;  %1572 = vmatmul.bf16.gmra.mxu1 %v4415_v54  ;;  %v3443_v37 = vld [vmem:[%s3758_s17 + $0x50] sm:$0xff]  ;;  %v3444_v40 = vld [vmem:[%s3758_s17 + $0x48] sm:$0xff] }
 0x290   : > { %v3164_v46 = vpop.eup %3163  ;;  %2250 = vst [vmem:[%s4231_s23 + $0x578] sm:$0xff] %v3162_v41  ;;  %2317 = vrot.lane.b32.xlu0 %v3444_v40, %s3644_s30  ;;  %v3445_v41 = vld [vmem:[%s3758_s17 + $0x58] sm:$0xff] }
 0x291   : > { %2251 = vst [vmem:[%s4231_s23 + $0x580] sm:$0xff] %v3164_v46  ;;  %3169 = vtanh.f32 %v1302_v43  ;;  %v1481_v57 = vpop.f32.mrf.mxu0  ;;  %2321 = vrot.lane.b32.xlu2 %v3445_v41, %s3644_s30 }
 0x292   : > { %v3166_v48 = vpop.eup %3165  ;;  %3171 = vtanh.f32 %v1391_v42  ;;  %v1482_v49 = vadd.f32 %v1481_v57, %v4210_v52 }
 0x293   : > { %2259 = vst [vmem:[%s4231_s23 + $0x5c0] sm:$0xff] %v3166_v48 }
 0x294   : > { %3173 = vtanh.f32 %v1482_v49  ;;  %v1535_v50 = vpop.f32.mrf.mxu1 }
 0x295   : > { %v3168_v53 = vpop.eup %3167  ;;  %v1536_v58 = vadd.f32 %v1535_v50, %v4438_v32  ;;  %2305 = vrot.lane.b32.xlu1 %v3437_v2, %s3644_s30 }
 0x296   : > { %2162 = vst [vmem:[%s4231_s23 + $0x2b8] sm:$0xff] %v3168_v53  ;;  %v1303_v62 = vpop.f32.mrf.mxu2  ;;  %v1392_v63 = vpop.f32.mrf.mxu3 }
 0x297   : > { %v3170_v34 = vpop.eup %3169  ;;  %3175 = vtanh.f32 %v1536_v58  ;;  %v1304_v0 = vadd.f32 %v1303_v62, %v4218_v59  ;;  %v1393_v1 = vadd.f32 %v1392_v63, %v4221_v61  ;;  %v3446_v58 = vld [vmem:[%s3758_s17 + $0x68] sm:$0xff]  ;;  %v3447_v62 = vld [vmem:[%s3758_s17 + $0x60] sm:$0xff]  ;;  %v3448_v63 = vld [vmem:[%s3758_s17 + $0x70] sm:$0xff] }
 0x298   : > { %v3172_v4 = vpop.eup %3171  ;;  %2257 = vst [vmem:[%s4231_s23 + $0x5b0] sm:$0xff] %v3170_v34  ;;  %2323 = vrot.lane.b32.xlu0 %v3447_v62, %s3644_s30 }
 0x299   : > { %2258 = vst [vmem:[%s4231_s23 + $0x5b8] sm:$0xff] %v3172_v4  ;;  %3177 = vtanh.f32 %v1304_v0  ;;  %v1484_v9 = vpop.f32.mrf.mxu0  ;;  %2327 = vrot.lane.b32.xlu2 %v3448_v63, %s3644_s30 }
 0x29a   : > { %v3174_v12 = vpop.eup %3173  ;;  %3179 = vtanh.f32 %v1393_v1  ;;  %v1485_v56 = vadd.f32 %v1484_v9, %v4210_v52 }
 0x29b   : > { %2266 = vst [vmem:[%s4231_s23 + $0x5f8] sm:$0xff] %v3174_v12  ;;  %1621 = vmatmul.bf16.gmra.mxu2 %v4171_v25  ;;  %1710 = vmatmul.bf16.gmra.mxu3 %v4171_v25  ;;  %v3449_v12 = vld [vmem:[#allocation9] sm:$0x7f] }
 0x29c   : > { %3181 = vtanh.f32 %v1485_v56  ;;  %1799 = vmatmul.bf16.gmra.mxu0 %v4171_v25  ;;  %v1538_v13 = vpop.f32.mrf.mxu1  ;;  %v3440_v25 = vld [vmem:[%s3758_s17 + $0x38] sm:$0xff]  ;;  %v4644_v56 = vperm.slane %v3449_v12, 6 }
 0x29d   : > { %v3176_v14 = vpop.eup %3175  ;;  %v1539_v19 = vadd.f32 %v1538_v13, %v4438_v32  ;;  %2313 = vrot.lane.b32.xlu1 %v3440_v25, %s3644_s30  ;;  %v4662_v25 = vperm.slane %v3449_v12, 5 }
 0x29e   : > { %2169 = vst [vmem:[%s4231_s23 + $0x2f0] sm:$0xff] %v3176_v14  ;;  %v1306_v10 = vpop.f32.mrf.mxu2  ;;  %v1395_v15 = vpop.f32.mrf.mxu3 }
 0x29f   : > { %v3178_v31 = vpop.eup %3177  ;;  %3183 = vtanh.f32 %v1539_v19  ;;  %v1307_v51 = vadd.f32 %v1306_v10, %v4218_v59  ;;  %v1396_v16 = vadd.f32 %v1395_v15, %v4221_v61  ;;  %1577 = vmatmul.bf16.gmra.mxu1 %v4435_v28  ;;  %v3450_v19 = vld [vmem:[%s3758_s17 + $0x80] sm:$0xff]  ;;  %v3451_v15 = vld [vmem:[%s3758_s17 + $0x78] sm:$0xff] }
 0x2a0   : > { %v3180_v18 = vpop.eup %3179  ;;  %2264 = vst [vmem:[%s4231_s23 + $0x5e8] sm:$0xff] %v3178_v31  ;;  %2329 = vrot.lane.b32.xlu0 %v3451_v15, %s3644_s30  ;;  %v3452_v31 = vld [vmem:[%s3758_s17 + $0x88] sm:$0xff] }
 0x2a1   : > { %2265 = vst [vmem:[%s4231_s23 + $0x5f0] sm:$0xff] %v3180_v18  ;;  %3185 = vtanh.f32 %v1307_v51  ;;  %v1486_v21 = vpop.f32.mrf.mxu0  ;;  %2333 = vrot.lane.b32.xlu2 %v3452_v31, %s3644_s30 }
 0x2a2   : > { %v3182_v22 = vpop.eup %3181  ;;  %3187 = vtanh.f32 %v1396_v16  ;;  %v1487_v23 = vadd.f32 %v1486_v21, %v4210_v52 }
 0x2a3   : > { %2273 = vst [vmem:[%s4231_s23 + $0x630] sm:$0xff] %v3182_v22 }
 0x2a4   : > { %3189 = vtanh.f32 %v1487_v23  ;;  %v1540_v26 = vpop.f32.mrf.mxu1 }
 0x2a5   : > { %v3184_v60 = vpop.eup %3183  ;;  %v1541_v29 = vadd.f32 %v1540_v26, %v4438_v32  ;;  %2319 = vrot.lane.b32.xlu1 %v3443_v37, %s3644_s30 }
 0x2a6   : > { %2176 = vst [vmem:[%s4231_s23 + $0x328] sm:$0xff] %v3184_v60  ;;  %v1308_v33 = vpop.f32.mrf.mxu2  ;;  %v1397_v35 = vpop.f32.mrf.mxu3 }
 0x2a7   : > { %v3186_v36 = vpop.eup %3185  ;;  %3191 = vtanh.f32 %v1541_v29  ;;  %v1309_v44 = vadd.f32 %v1308_v33, %v4218_v59  ;;  %v1398_v47 = vadd.f32 %v1397_v35, %v4221_v61  ;;  %v3453_v29 = vld [vmem:[%s3758_s17 + $0x98] sm:$0xff]  ;;  %v3454_v33 = vld [vmem:[%s3758_s17 + $0x90] sm:$0xff]  ;;  %v3455_v35 = vld [vmem:[%s3758_s17 + $0xa0] sm:$0xff] }
 0x2a8   : > { %v3188_v39 = vpop.eup %3187  ;;  %2271 = vst [vmem:[%s4231_s23 + $0x620] sm:$0xff] %v3186_v36  ;;  %2335 = vrot.lane.b32.xlu0 %v3454_v33, %s3644_s30 }
 0x2a9   : > { %2272 = vst [vmem:[%s4231_s23 + $0x628] sm:$0xff] %v3188_v39  ;;  %3193 = vtanh.f32 %v1309_v44  ;;  %v1489_v43 = vpop.f32.mrf.mxu0  ;;  %2339 = vrot.lane.b32.xlu2 %v3455_v35, %s3644_s30 }
 0x2aa   : > { %v3190_v42 = vpop.eup %3189  ;;  %3195 = vtanh.f32 %v1398_v47  ;;  %v1490_v3 = vadd.f32 %v1489_v43, %v4210_v52 }
 0x2ab   : > { %2280 = vst [vmem:[%s4231_s23 + $0x668] sm:$0xff] %v3190_v42  ;;  %1626 = vmatmul.bf16.gmra.mxu2 %v4184_v38  ;;  %1715 = vmatmul.bf16.gmra.mxu3 %v4184_v38 }
 0x2ac   : > { %3197 = vtanh.f32 %v1490_v3  ;;  %1804 = vmatmul.bf16.gmra.mxu0 %v4184_v38  ;;  %v1543_v46 = vpop.f32.mrf.mxu1 }
 0x2ad   : > { %v3192_v30 = vpop.eup %3191  ;;  %v1544_v7 = vadd.f32 %v1543_v46, %v4438_v32  ;;  %2325 = vrot.lane.b32.xlu1 %v3446_v58, %s3644_s30 }
 0x2ae   : > { %2183 = vst [vmem:[%s4231_s23 + $0x360] sm:$0xff] %v3192_v30  ;;  %v1311_v57 = vpop.f32.mrf.mxu2  ;;  %v1400_v48 = vpop.f32.mrf.mxu3  ;;  %v3456_v30 = vld [vmem:[%s3758_s17 + $0xb0] sm:$0xff] }
 0x2af   : > { %v3194_v49 = vpop.eup %3193  ;;  %3199 = vtanh.f32 %v1544_v7  ;;  %v1312_v50 = vadd.f32 %v1311_v57, %v4218_v59  ;;  %v1401_v53 = vadd.f32 %v1400_v48, %v4221_v61  ;;  %v3457_v57 = vld [vmem:[%s3758_s17 + $0xa8] sm:$0xff]  ;;  %v3458_v48 = vld [vmem:[%s3758_s17 + $0xb8] sm:$0xff] }
 0x2b0   : > { %v3196_v38 = vpop.eup %3195  ;;  %2278 = vst [vmem:[%s4231_s23 + $0x658] sm:$0xff] %v3194_v49  ;;  %2341 = vrot.lane.b32.xlu0 %v3457_v57, %s3644_s30 }
 0x2b1   : > { %2279 = vst [vmem:[%s4231_s23 + $0x660] sm:$0xff] %v3196_v38  ;;  %3201 = vtanh.f32 %v1312_v50  ;;  %v1491_v34 = vpop.f32.mrf.mxu0  ;;  %2345 = vrot.lane.b32.xlu2 %v3458_v48, %s3644_s30 }
 0x2b2   : > { %v3198_v0 = vpop.eup %3197  ;;  %3203 = vtanh.f32 %v1401_v53  ;;  %v1492_v1 = vadd.f32 %v1491_v34, %v4210_v52 }
 0x2b3   : > { %2287 = vst [vmem:[%s4231_s23 + $0x6a0] sm:$0xff] %v3198_v0 }
 0x2b4   : > { %3205 = vtanh.f32 %v1492_v1  ;;  %v1545_v2 = vpop.f32.mrf.mxu1 }
 0x2b5   : > { %v3200_v4 = vpop.eup %3199  ;;  %v1546_v5 = vadd.f32 %v1545_v2, %v4438_v32  ;;  %2331 = vrot.lane.b32.xlu1 %v3450_v19, %s3644_s30 }
 0x2b6   : > { %2190 = vst [vmem:[%s4231_s23 + $0x398] sm:$0xff] %v3200_v4  ;;  %v1313_v8 = vpop.f32.mrf.mxu2  ;;  %v1402_v9 = vpop.f32.mrf.mxu3  ;;  %v3459_v4 = vld [vmem:[%s3758_s17 + $0xc8] sm:$0xff] }
 0x2b7   : > { %v3202_v13 = vpop.eup %3201  ;;  %3207 = vtanh.f32 %v1546_v5  ;;  %v1314_v52 = vadd.f32 %v1313_v8, %v4218_v59  ;;  %v1403_v14 = vadd.f32 %v1402_v9, %v4221_v61  ;;  %v4660_v61 = vperm.slane %v3449_v12, 4  ;;  %v3460_v5 = vld [vmem:[%s3758_s17 + $0xc0] sm:$0xff]  ;;  %v3461_v8 = vld [vmem:[%s3758_s17 + $0xd0] sm:$0xff] }
 0x2b8   : > { %v3204_v10 = vpop.eup %3203  ;;  %2285 = vst [vmem:[%s4231_s23 + $0x690] sm:$0xff] %v3202_v13  ;;  %2347 = vrot.lane.b32.xlu0 %v3460_v5, %s3644_s30 }
 0x2b9   : > { %2286 = vst [vmem:[%s4231_s23 + $0x698] sm:$0xff] %v3204_v10  ;;  %3209 = vtanh.f32 %v1314_v52  ;;  %v1770_v51 = vpop.f32.mrf.mxu0  ;;  %2351 = vrot.lane.b32.xlu2 %v3461_v8, %s3644_s30 }
 0x2ba   : > { %v3206_v16 = vpop.eup %3205  ;;  %3211 = vtanh.f32 %v1403_v14  ;;  %v1771_v59 = vadd.f32 %v1770_v51, %v4644_v56 }
 0x2bb   : > { %2294 = vst [vmem:[%s4231_s23 + $0x6d8] sm:$0xff] %v3206_v16  ;;  %1631 = vmatmul.bf16.gmra.mxu2 %v4212_v55  ;;  %1720 = vmatmul.bf16.gmra.mxu3 %v4212_v55 }
 0x2bc   : > { %3213 = vtanh.f32 %v1771_v59  ;;  %1809 = vmatmul.bf16.gmra.mxu0 %v4212_v55  ;;  %v1548_v18 = vpop.f32.mrf.mxu1  ;;  %v3462_v59 = vld [vmem:[%s3758_s17 + $0xe0] sm:$0xff] }
 0x2bd   : > { %v3208_v17 = vpop.eup %3207  ;;  %v1549_v20 = vadd.f32 %v1548_v18, %v4438_v32  ;;  %2337 = vrot.lane.b32.xlu1 %v3453_v29, %s3644_s30 }
 0x2be   : > { %2197 = vst [vmem:[%s4231_s23 + $0x3d0] sm:$0xff] %v3208_v17  ;;  %v1592_v21 = vpop.f32.mrf.mxu2  ;;  %v1681_v22 = vpop.f32.mrf.mxu3  ;;  %v3463_v17 = vld [vmem:[%s3758_s17 + $0xd8] sm:$0xff] }
 0x2bf   : > { %v3210_v23 = vpop.eup %3209  ;;  %3215 = vtanh.f32 %v1549_v20  ;;  %v1593_v26 = vadd.f32 %v1592_v21, %v4660_v61  ;;  %v1682_v60 = vadd.f32 %v1681_v22, %v4662_v25  ;;  %v3464_v20 = vld [vmem:[%s3758_s17 + $0xe8] sm:$0xff] }
 0x2c0   : > { %v3212_v55 = vpop.eup %3211  ;;  %2292 = vst [vmem:[%s4231_s23 + $0x6c8] sm:$0xff] %v3210_v23  ;;  %2353 = vrot.lane.b32.xlu0 %v3463_v17, %s3644_s30 }
 0x2c1   : > { %2293 = vst [vmem:[%s4231_s23 + $0x6d0] sm:$0xff] %v3212_v55  ;;  %3217 = vtanh.f32 %v1593_v26  ;;  %v1772_v36 = vpop.f32.mrf.mxu0  ;;  %2357 = vrot.lane.b32.xlu2 %v3464_v20, %s3644_s30 }
 0x2c2   : > { %v3214_v44 = vpop.eup %3213  ;;  %3219 = vtanh.f32 %v1682_v60  ;;  %v1773_v47 = vadd.f32 %v1772_v36, %v4644_v56 }
 0x2c3   : > { %2081 = vst.msk [vmem:[%s4231_s23 + $0x30] sm:$0xff] %vm2080_vm1, %v3214_v44 }
 0x2c4   : > { %3221 = vtanh.f32 %v1773_v47  ;;  %v1550_v37 = vpop.f32.mrf.mxu1  ;;  %v3465_v47 = vld [vmem:[%s3758_s17 + $0xf8] sm:$0xff] }
 0x2c5   : > { %v3216_v39 = vpop.eup %3215  ;;  %v1551_v40 = vadd.f32 %v1550_v37, %v4438_v32  ;;  %2343 = vrot.lane.b32.xlu1 %v3456_v30, %s3644_s30  ;;  %v3466_v37 = vld [vmem:[%s3758_s17 + $0xf0] sm:$0xff] }
 0x2c6   : > { %2204 = vst [vmem:[%s4231_s23 + $0x408] sm:$0xff] %v3216_v39  ;;  %v1594_v41 = vpop.f32.mrf.mxu2  ;;  %v1683_v43 = vpop.f32.mrf.mxu3 }
 0x2c7   : > { %v3218_v42 = vpop.eup %3217  ;;  %3223 = vtanh.f32 %v1551_v40  ;;  %v1595_v3 = vadd.f32 %v1594_v41, %v4660_v61  ;;  %v1684_v46 = vadd.f32 %v1683_v43, %v4662_v25 }
 0x2c8   : > { %v3220_v7 = vpop.eup %3219  ;;  %2078 = vst [vmem:[%s4231_s23 + $0x20] sm:$0xff] %v3218_v42  ;;  %2359 = vrot.lane.b32.xlu0 %v3466_v37, %s3644_s30 }
 0x2c9   : > { %2079 = vst [vmem:[%s4231_s23 + $0x28] sm:$0xff] %v3220_v7  ;;  %3225 = vtanh.f32 %v1595_v3  ;;  %v1775_v49 = vpop.f32.mrf.mxu0 }
 0x2ca   : > { %v3222_v50 = vpop.eup %3221  ;;  %3227 = vtanh.f32 %v1684_v46  ;;  %v1776_v53 = vadd.f32 %v1775_v49, %v4644_v56 }
 0x2cb   : > { %1636 = vmatmul.bf16.gmra.mxu2 %v4247_v24  ;;  %1725 = vmatmul.bf16.gmra.mxu3 %v4247_v24  ;;  %2088 = vst.msk [vmem:[%s4231_s23 + $0x68] sm:$0xff] %vm2080_vm1, %v3222_v50 }
 0x2cc   : > { %3229 = vtanh.f32 %v1776_v53  ;;  %1814 = vmatmul.bf16.gmra.mxu0 %v4247_v24  ;;  %v1553_v58 = vpop.f32.mrf.mxu1 }
 0x2cd   : > { %v3224_v38 = vpop.eup %3223  ;;  %v1554_v62 = vadd.f32 %v1553_v58, %v4438_v32  ;;  %2349 = vrot.lane.b32.xlu1 %v3459_v4, %s3644_s30 }
 0x2ce   : > { %2211 = vst [vmem:[%s4231_s23 + $0x440] sm:$0xff] %v3224_v38  ;;  %v1597_v63 = vpop.f32.mrf.mxu2  ;;  %v1686_v34 = vpop.f32.mrf.mxu3 }
 0x2cf   : > { %v3226_v0 = vpop.eup %3225  ;;  %3231 = vtanh.f32 %v1554_v62  ;;  %v1598_v1 = vadd.f32 %v1597_v63, %v4660_v61  ;;  %v1687_v2 = vadd.f32 %v1686_v34, %v4662_v25 }
 0x2d0   : > { %v3228_v24 = vpop.eup %3227  ;;  %2086 = vst [vmem:[%s4231_s23 + $0x58] sm:$0xff] %v3226_v0 }
 0x2d1   : > { %2087 = vst [vmem:[%s4231_s23 + $0x60] sm:$0xff] %v3228_v24  ;;  %3233 = vtanh.f32 %v1598_v1  ;;  %v1777_v9 = vpop.f32.mrf.mxu0 }
 0x2d2   : > { %v3230_v12 = vpop.eup %3229  ;;  %3235 = vtanh.f32 %v1687_v2  ;;  %v1778_v13 = vadd.f32 %v1777_v9, %v4644_v56 }
 0x2d3   : > { %2095 = vst.msk [vmem:[%s4231_s23 + $0xa0] sm:$0xff] %vm2080_vm1, %v3230_v12 }
 0x2d4   : > { %3237 = vtanh.f32 %v1778_v13  ;;  %v1555_v52 = vpop.f32.mrf.mxu1 }
 0x2d5   : > { %v3232_v14 = vpop.eup %3231  ;;  %v1556_v19 = vadd.f32 %v1555_v52, %v4438_v32  ;;  %2355 = vrot.lane.b32.xlu1 %v3462_v59, %s3644_s30 }
 0x2d6   : > { %2218 = vst [vmem:[%s4231_s23 + $0x478] sm:$0xff] %v3232_v14  ;;  %v1599_v10 = vpop.f32.mrf.mxu2  ;;  %v1688_v15 = vpop.f32.mrf.mxu3 }
 0x2d7   : > { %v3234_v31 = vpop.eup %3233  ;;  %3239 = vtanh.f32 %v1556_v19  ;;  %v1600_v51 = vadd.f32 %v1599_v10, %v4660_v61  ;;  %v1689_v16 = vadd.f32 %v1688_v15, %v4662_v25 }
 0x2d8   : > { %v3236_v18 = vpop.eup %3235  ;;  %2093 = vst [vmem:[%s4231_s23 + $0x90] sm:$0xff] %v3234_v31 }
 0x2d9   : > { %2094 = vst [vmem:[%s4231_s23 + $0x98] sm:$0xff] %v3236_v18  ;;  %3241 = vtanh.f32 %v1600_v51  ;;  %v1780_v21 = vpop.f32.mrf.mxu0 }
 0x2da   : > { %v3238_v22 = vpop.eup %3237  ;;  %3243 = vtanh.f32 %v1689_v16  ;;  %v1781_v23 = vadd.f32 %v1780_v21, %v4644_v56 }
 0x2db   : > { %1641 = vmatmul.bf16.gmra.mxu2 %v4282_v6  ;;  %1730 = vmatmul.bf16.gmra.mxu3 %v4282_v6  ;;  %2102 = vst.msk [vmem:[%s4231_s23 + $0xd8] sm:$0xff] %vm2080_vm1, %v3238_v22 }
 0x2dc   : > { %3245 = vtanh.f32 %v1781_v23  ;;  %1819 = vmatmul.bf16.gmra.mxu0 %v4282_v6  ;;  %v1558_v26 = vpop.f32.mrf.mxu1 }
 0x2dd   : > { %v3240_v60 = vpop.eup %3239  ;;  %v1559_v29 = vadd.f32 %v1558_v26, %v4438_v32  ;;  %2361 = vrot.lane.b32.xlu1 %v3465_v47, %s3644_s30 }
 0x2de   : > { %2225 = vst [vmem:[%s4231_s23 + $0x4b0] sm:$0xff] %v3240_v60  ;;  %v1602_v55 = vpop.f32.mrf.mxu2  ;;  %v1691_v33 = vpop.f32.mrf.mxu3 }
 0x2df   : > { %v3242_v35 = vpop.eup %3241  ;;  %3247 = vtanh.f32 %v1559_v29  ;;  %v1603_v36 = vadd.f32 %v1602_v55, %v4660_v61  ;;  %v1692_v44 = vadd.f32 %v1691_v33, %v4662_v25 }
 0x2e0   : > { %v3244_v6 = vpop.eup %3243  ;;  %2100 = vst [vmem:[%s4231_s23 + $0xc8] sm:$0xff] %v3242_v35 }
 0x2e1   : > { %2101 = vst [vmem:[%s4231_s23 + $0xd0] sm:$0xff] %v3244_v6  ;;  %3249 = vtanh.f32 %v1603_v36  ;;  %v1782_v39 = vpop.f32.mrf.mxu0 }
 0x2e2   : > { %v3246_v40 = vpop.eup %3245  ;;  %3251 = vtanh.f32 %v1692_v44  ;;  %v1783_v41 = vadd.f32 %v1782_v39, %v4644_v56 }
 0x2e3   : > { %2109 = vst.msk [vmem:[%s4231_s23 + $0x110] sm:$0xff] %vm2080_vm1, %v3246_v40 }
 0x2e4   : > { %3253 = vtanh.f32 %v1783_v41  ;;  %v1560_v43 = vpop.f32.mrf.mxu1 }
 0x2e5   : > { %v3248_v42 = vpop.eup %3247  ;;  %v1561_v3 = vadd.f32 %v1560_v43, %v4438_v32 }
 0x2e6   : > { %2232 = vst [vmem:[%s4231_s23 + $0x4e8] sm:$0xff] %v3248_v42  ;;  %v1604_v46 = vpop.f32.mrf.mxu2  ;;  %v1693_v30 = vpop.f32.mrf.mxu3 }
 0x2e7   : > { %v3250_v7 = vpop.eup %3249  ;;  %3255 = vtanh.f32 %v1561_v3  ;;  %v1605_v57 = vadd.f32 %v1604_v46, %v4660_v61  ;;  %v1694_v48 = vadd.f32 %v1693_v30, %v4662_v25 }
 0x2e8   : > { %v3252_v49 = vpop.eup %3251  ;;  %2107 = vst [vmem:[%s4231_s23 + $0x100] sm:$0xff] %v3250_v7 }
 0x2e9   : > { %2108 = vst [vmem:[%s4231_s23 + $0x108] sm:$0xff] %v3252_v49  ;;  %3257 = vtanh.f32 %v1605_v57  ;;  %v1785_v50 = vpop.f32.mrf.mxu0 }
 0x2ea   : > { %v3254_v53 = vpop.eup %3253  ;;  %3259 = vtanh.f32 %v1694_v48  ;;  %v1786_v58 = vadd.f32 %v1785_v50, %v4644_v56 }
 0x2eb   : > { %1646 = vmatmul.bf16.gmra.mxu2 %v4308_v45  ;;  %1735 = vmatmul.bf16.gmra.mxu3 %v4308_v45  ;;  %2116 = vst.msk [vmem:[%s4231_s23 + $0x148] sm:$0xff] %vm2080_vm1, %v3254_v53 }
 0x2ec   : > { %3261 = vtanh.f32 %v1786_v58  ;;  %1824 = vmatmul.bf16.gmra.mxu0 %v4308_v45  ;;  %v1563_v38 = vpop.f32.mrf.mxu1 }
 0x2ed   : > { %v3256_v62 = vpop.eup %3255  ;;  %v1564_v63 = vadd.f32 %v1563_v38, %v4438_v32 }
 0x2ee   : > { %2239 = vst [vmem:[%s4231_s23 + $0x520] sm:$0xff] %v3256_v62  ;;  %v1607_v34 = vpop.f32.mrf.mxu2  ;;  %v1696_v0 = vpop.f32.mrf.mxu3 }
 0x2ef   : > { %v3258_v1 = vpop.eup %3257  ;;  %3263 = vtanh.f32 %v1564_v63  ;;  %v1608_v2 = vadd.f32 %v1607_v34, %v4660_v61  ;;  %v1697_v4 = vadd.f32 %v1696_v0, %v4662_v25 }
 0x2f0   : > { %v3260_v24 = vpop.eup %3259  ;;  %2114 = vst [vmem:[%s4231_s23 + $0x138] sm:$0xff] %v3258_v1 }
 0x2f1   : > { %2115 = vst [vmem:[%s4231_s23 + $0x140] sm:$0xff] %v3260_v24  ;;  %3265 = vtanh.f32 %v1608_v2  ;;  %v1787_v45 = vpop.f32.mrf.mxu0 }
 0x2f2   : > { %v3262_v5 = vpop.eup %3261  ;;  %3267 = vtanh.f32 %v1697_v4  ;;  %v1788_v8 = vadd.f32 %v1787_v45, %v4644_v56 }
 0x2f3   : > { %2123 = vst.msk [vmem:[%s4231_s23 + $0x180] sm:$0xff] %vm2080_vm1, %v3262_v5 }
 0x2f4   : > { %3269 = vtanh.f32 %v1788_v8  ;;  %v1565_v9 = vpop.f32.mrf.mxu1 }
 0x2f5   : > { %v3264_v12 = vpop.eup %3263  ;;  %v1566_v13 = vadd.f32 %v1565_v9, %v4438_v32 }
 0x2f6   : > { %2246 = vst [vmem:[%s4231_s23 + $0x558] sm:$0xff] %v3264_v12  ;;  %v1609_v52 = vpop.f32.mrf.mxu2  ;;  %v1698_v14 = vpop.f32.mrf.mxu3 }
 0x2f7   : > { %v3266_v19 = vpop.eup %3265  ;;  %3271 = vtanh.f32 %v1566_v13  ;;  %v1610_v10 = vadd.f32 %v1609_v52, %v4660_v61  ;;  %v1699_v15 = vadd.f32 %v1698_v14, %v4662_v25 }
 0x2f8   : > { %v3268_v31 = vpop.eup %3267  ;;  %2121 = vst [vmem:[%s4231_s23 + $0x170] sm:$0xff] %v3266_v19 }
 0x2f9   : > { %2122 = vst [vmem:[%s4231_s23 + $0x178] sm:$0xff] %v3268_v31  ;;  %3273 = vtanh.f32 %v1610_v10  ;;  %v1790_v51 = vpop.f32.mrf.mxu0 }
 0x2fa   : > { %v3270_v16 = vpop.eup %3269  ;;  %3275 = vtanh.f32 %v1699_v15  ;;  %v1791_v59 = vadd.f32 %v1790_v51, %v4644_v56 }
 0x2fb   : > { %1651 = vmatmul.bf16.gmra.mxu2 %v4343_v27  ;;  %1740 = vmatmul.bf16.gmra.mxu3 %v4343_v27  ;;  %2130 = vst.msk [vmem:[%s4231_s23 + $0x1b8] sm:$0xff] %vm2080_vm1, %v3270_v16 }
 0x2fc   : > { %3277 = vtanh.f32 %v1791_v59  ;;  %1829 = vmatmul.bf16.gmra.mxu0 %v4343_v27  ;;  %v1568_v18 = vpop.f32.mrf.mxu1 }
 0x2fd   : > { %v3272_v17 = vpop.eup %3271  ;;  %v1569_v20 = vadd.f32 %v1568_v18, %v4438_v32 }
 0x2fe   : > { %2253 = vst [vmem:[%s4231_s23 + $0x590] sm:$0xff] %v3272_v17  ;;  %v1612_v21 = vpop.f32.mrf.mxu2  ;;  %v1701_v22 = vpop.f32.mrf.mxu3 }
 0x2ff   : > { %v3274_v23 = vpop.eup %3273  ;;  %3279 = vtanh.f32 %v1569_v20  ;;  %v1613_v26 = vadd.f32 %v1612_v21, %v4660_v61  ;;  %v1702_v60 = vadd.f32 %v1701_v22, %v4662_v25 }
 0x300   : > { %v3276_v29 = vpop.eup %3275  ;;  %2128 = vst [vmem:[%s4231_s23 + $0x1a8] sm:$0xff] %v3274_v23 }
 0x301   : > { %2129 = vst [vmem:[%s4231_s23 + $0x1b0] sm:$0xff] %v3276_v29  ;;  %3281 = vtanh.f32 %v1613_v26  ;;  %v1792_v27 = vpop.f32.mrf.mxu0 }
 0x302   : > { %v3278_v55 = vpop.eup %3277  ;;  %3283 = vtanh.f32 %v1702_v60  ;;  %v1793_v33 = vadd.f32 %v1792_v27, %v4644_v56 }
 0x303   : > { %2137 = vst.msk [vmem:[%s4231_s23 + $0x1f0] sm:$0xff] %vm2080_vm1, %v3278_v55 }
 0x304   : > { %3285 = vtanh.f32 %v1793_v33  ;;  %v1570_v35 = vpop.f32.mrf.mxu1 }
 0x305   : > { %v3280_v36 = vpop.eup %3279  ;;  %v1571_v44 = vadd.f32 %v1570_v35, %v4438_v32 }
 0x306   : > { %2260 = vst [vmem:[%s4231_s23 + $0x5c8] sm:$0xff] %v3280_v36  ;;  %v1614_v47 = vpop.f32.mrf.mxu2  ;;  %v1703_v6 = vpop.f32.mrf.mxu3 }
 0x307   : > { %v3282_v37 = vpop.eup %3281  ;;  %3287 = vtanh.f32 %v1571_v44  ;;  %v1615_v39 = vadd.f32 %v1614_v47, %v4660_v61  ;;  %v1704_v40 = vadd.f32 %v1703_v6, %v4662_v25 }
 0x308   : > { %v3284_v41 = vpop.eup %3283  ;;  %2135 = vst [vmem:[%s4231_s23 + $0x1e0] sm:$0xff] %v3282_v37 }
 0x309   : > { %2136 = vst [vmem:[%s4231_s23 + $0x1e8] sm:$0xff] %v3284_v41  ;;  %3289 = vtanh.f32 %v1615_v39  ;;  %v1795_v43 = vpop.f32.mrf.mxu0 }
 0x30a   : > { %v3286_v42 = vpop.eup %3285  ;;  %3291 = vtanh.f32 %v1704_v40  ;;  %v1796_v3 = vadd.f32 %v1795_v43, %v4644_v56 }
 0x30b   : > { %1656 = vmatmul.bf16.gmra.mxu2 %v4370_v11  ;;  %1745 = vmatmul.bf16.gmra.mxu3 %v4370_v11  ;;  %2144 = vst.msk [vmem:[%s4231_s23 + $0x228] sm:$0xff] %vm2080_vm1, %v3286_v42 }
 0x30c   : > { %3293 = vtanh.f32 %v1796_v3  ;;  %1834 = vmatmul.bf16.gmra.mxu0 %v4370_v11  ;;  %v1573_v46 = vpop.f32.mrf.mxu1 }
 0x30d   : > { %v3288_v30 = vpop.eup %3287  ;;  %v1574_v7 = vadd.f32 %v1573_v46, %v4438_v32 }
 0x30e   : > { %2267 = vst [vmem:[%s4231_s23 + $0x600] sm:$0xff] %v3288_v30  ;;  %v1617_v57 = vpop.f32.mrf.mxu2  ;;  %v1706_v48 = vpop.f32.mrf.mxu3 }
 0x30f   : > { %v3290_v49 = vpop.eup %3289  ;;  %3295 = vtanh.f32 %v1574_v7  ;;  %v1618_v50 = vadd.f32 %v1617_v57, %v4660_v61  ;;  %v1707_v53 = vadd.f32 %v1706_v48, %v4662_v25 }
 0x310   : > { %v3292_v58 = vpop.eup %3291  ;;  %2142 = vst [vmem:[%s4231_s23 + $0x218] sm:$0xff] %v3290_v49 }
 0x311   : > { %2143 = vst [vmem:[%s4231_s23 + $0x220] sm:$0xff] %v3292_v58  ;;  %3297 = vtanh.f32 %v1618_v50  ;;  %v1797_v11 = vpop.f32.mrf.mxu0 }
 0x312   : > { %v3294_v38 = vpop.eup %3293  ;;  %3299 = vtanh.f32 %v1707_v53  ;;  %v1798_v62 = vadd.f32 %v1797_v11, %v4644_v56 }
 0x313   : > { %2151 = vst.msk [vmem:[%s4231_s23 + $0x260] sm:$0xff] %vm2080_vm1, %v3294_v38 }
 0x314   : > { %3301 = vtanh.f32 %v1798_v62  ;;  %v1575_v63 = vpop.f32.mrf.mxu1 }
 0x315   : > { %v3296_v34 = vpop.eup %3295  ;;  %v1576_v0 = vadd.f32 %v1575_v63, %v4438_v32 }
 0x316   : > { %2274 = vst [vmem:[%s4231_s23 + $0x638] sm:$0xff] %v3296_v34  ;;  %v1619_v1 = vpop.f32.mrf.mxu2  ;;  %v1708_v2 = vpop.f32.mrf.mxu3 }
 0x317   : > { %v3298_v4 = vpop.eup %3297  ;;  %3303 = vtanh.f32 %v1576_v0  ;;  %v1620_v24 = vadd.f32 %v1619_v1, %v4660_v61  ;;  %v1709_v45 = vadd.f32 %v1708_v2, %v4662_v25 }
 0x318   : > { %v3300_v5 = vpop.eup %3299  ;;  %2149 = vst [vmem:[%s4231_s23 + $0x250] sm:$0xff] %v3298_v4 }
 0x319   : > { %2150 = vst [vmem:[%s4231_s23 + $0x258] sm:$0xff] %v3300_v5  ;;  %3305 = vtanh.f32 %v1620_v24  ;;  %v1800_v8 = vpop.f32.mrf.mxu0 }
 0x31a   : > { %v3302_v9 = vpop.eup %3301  ;;  %3307 = vtanh.f32 %v1709_v45  ;;  %v1801_v12 = vadd.f32 %v1800_v8, %v4644_v56 }
 0x31b   : > { %1661 = vmatmul.bf16.gmra.mxu2 %v4415_v54  ;;  %1750 = vmatmul.bf16.gmra.mxu3 %v4415_v54  ;;  %2158 = vst.msk [vmem:[%s4231_s23 + $0x298] sm:$0xff] %vm2080_vm1, %v3302_v9 }
 0x31c   : > { %3309 = vtanh.f32 %v1801_v12  ;;  %1839 = vmatmul.bf16.gmra.mxu0 %v4415_v54  ;;  %v1578_v13 = vpop.f32.mrf.mxu1 }
 0x31d   : > { %v3304_v52 = vpop.eup %3303  ;;  %v1579_v14 = vadd.f32 %v1578_v13, %v4438_v32 }
 0x31e   : > { %2281 = vst [vmem:[%s4231_s23 + $0x670] sm:$0xff] %v3304_v52  ;;  %v1622_v19 = vpop.f32.mrf.mxu2  ;;  %v1711_v10 = vpop.f32.mrf.mxu3 }
 0x31f   : > { %v3306_v15 = vpop.eup %3305  ;;  %3311 = vtanh.f32 %v1579_v14  ;;  %v1623_v31 = vadd.f32 %v1622_v19, %v4660_v61  ;;  %v1712_v51 = vadd.f32 %v1711_v10, %v4662_v25 }
 0x320   : > { %v3308_v16 = vpop.eup %3307  ;;  %2156 = vst [vmem:[%s4231_s23 + $0x288] sm:$0xff] %v3306_v15 }
 0x321   : > { %2157 = vst [vmem:[%s4231_s23 + $0x290] sm:$0xff] %v3308_v16  ;;  %3313 = vtanh.f32 %v1623_v31  ;;  %v1802_v54 = vpop.f32.mrf.mxu0 }
 0x322   : > { %v3310_v59 = vpop.eup %3309  ;;  %3315 = vtanh.f32 %v1712_v51  ;;  %v1803_v18 = vadd.f32 %v1802_v54, %v4644_v56 }
 0x323   : > { %2165 = vst.msk [vmem:[%s4231_s23 + $0x2d0] sm:$0xff] %vm2080_vm1, %v3310_v59 }
 0x324   : > { %3317 = vtanh.f32 %v1803_v18  ;;  %v1580_v17 = vpop.f32.mrf.mxu1 }
 0x325   : > { %v3312_v20 = vpop.eup %3311  ;;  %v1581_v21 = vadd.f32 %v1580_v17, %v4438_v32 }
 0x326   : > { %2288 = vst [vmem:[%s4231_s23 + $0x6a8] sm:$0xff] %v3312_v20  ;;  %v1624_v22 = vpop.f32.mrf.mxu2  ;;  %v1713_v23 = vpop.f32.mrf.mxu3 }
 0x327   : > { %v3314_v26 = vpop.eup %3313  ;;  %3319 = vtanh.f32 %v1581_v21  ;;  %v1625_v60 = vadd.f32 %v1624_v22, %v4660_v61  ;;  %v1714_v29 = vadd.f32 %v1713_v23, %v4662_v25 }
 0x328   : > { %v3316_v27 = vpop.eup %3315  ;;  %2163 = vst [vmem:[%s4231_s23 + $0x2c0] sm:$0xff] %v3314_v26 }
 0x329   : > { %2164 = vst [vmem:[%s4231_s23 + $0x2c8] sm:$0xff] %v3316_v27  ;;  %3321 = vtanh.f32 %v1625_v60  ;;  %v1805_v55 = vpop.f32.mrf.mxu0 }
 0x32a   : > { %v3318_v33 = vpop.eup %3317  ;;  %3323 = vtanh.f32 %v1714_v29  ;;  %v1806_v32 = vadd.f32 %v1805_v55, %v4644_v56 }
 0x32b   : > { %1666 = vmatmul.bf16.gmra.mxu2 %v4435_v28  ;;  %1755 = vmatmul.bf16.gmra.mxu3 %v4435_v28  ;;  %2172 = vst.msk [vmem:[%s4231_s23 + $0x308] sm:$0xff] %vm2080_vm1, %v3318_v33 }
 0x32c   : > { %3325 = vtanh.f32 %v1806_v32 }
 0x32d   : > { %v3320_v35 = vpop.eup %3319 }
 0x32e   : > { %2295 = vst [vmem:[%s4231_s23 + $0x6e0] sm:$0xff] %v3320_v35  ;;  %v1627_v36 = vpop.f32.mrf.mxu2  ;;  %v1716_v44 = vpop.f32.mrf.mxu3 }
 0x32f   : > { %v3322_v47 = vpop.eup %3321  ;;  %v1628_v6 = vadd.f32 %v1627_v36, %v4660_v61  ;;  %v1717_v37 = vadd.f32 %v1716_v44, %v4662_v25  ;;  %v2304_v36 = vpop.permute.xlu1 %2303 }
 0x330   : > { %v3324_v39 = vpop.eup %3323  ;;  %2170 = vst [vmem:[%s4231_s23 + $0x2f8] sm:$0xff] %v3322_v47 }
 0x331   : > { %2171 = vst [vmem:[%s4231_s23 + $0x300] sm:$0xff] %v3324_v39  ;;  %3327 = vtanh.f32 %v1628_v6  ;;  %v1807_v40 = vpop.f32.mrf.mxu0  ;;  %v2300_v6 = vpop.permute.xlu0 %2299 }
 0x332   : > { %v3326_v41 = vpop.eup %3325  ;;  %3329 = vtanh.f32 %v1717_v37  ;;  %v1808_v43 = vadd.f32 %v1807_v40, %v4644_v56  ;;  %2398 = vst.msk [vmem:[%s4231_s23 + $0xa0] sm:$0xff] %vm2395_vm2, %v2304_v36 }
 0x333   : > { %2179 = vst.msk [vmem:[%s4231_s23 + $0x340] sm:$0xff] %vm2080_vm1, %v3326_v41 }
 0x334   : > { %3331 = vtanh.f32 %v1808_v43  ;;  %2396 = vst.msk [vmem:[%s4231_s23 + $0x30] sm:$0xff] %vm2395_vm2, %v2300_v6 }
 0x336   : > { %v1629_v42 = vpop.f32.mrf.mxu2  ;;  %v1718_v3 = vpop.f32.mrf.mxu3 }
 0x337   : > { %v3328_v46 = vpop.eup %3327  ;;  %v1630_v30 = vadd.f32 %v1629_v42, %v4660_v61  ;;  %v1719_v7 = vadd.f32 %v1718_v3, %v4662_v25 }
 0x338   : > { %v3330_v57 = vpop.eup %3329  ;;  %2177 = vst [vmem:[%s4231_s23 + $0x330] sm:$0xff] %v3328_v46  ;;  %v2308_v46 = vpop.permute.xlu2 %2307 }
 0x339   : > { %2178 = vst [vmem:[%s4231_s23 + $0x338] sm:$0xff] %v3330_v57  ;;  %3333 = vtanh.f32 %v1630_v30  ;;  %v1810_v48 = vpop.f32.mrf.mxu0  ;;  %v2306_v57 = vpop.permute.xlu1 %2305 }
 0x33a   : > { %v3332_v49 = vpop.eup %3331  ;;  %3335 = vtanh.f32 %v1719_v7  ;;  %v1811_v50 = vadd.f32 %v1810_v48, %v4644_v56  ;;  %2400 = vst.msk [vmem:[%s4231_s23 + $0x110] sm:$0xff] %vm2395_vm2, %v2308_v46  ;;  %v2302_v48 = vpop.permute.xlu0 %2301 }
 0x33b   : > { %1844 = vmatmul.bf16.vlgmr.msrb.gmra.mxu3 %v4435_v28  ;;  %2186 = vst.msk [vmem:[%s4231_s23 + $0x378] sm:$0xff] %vm2080_vm1, %v3332_v49 }
 0x33c   : > { %3337 = vtanh.f32 %v1811_v50  ;;  %2399 = vst.msk [vmem:[%s4231_s23 + $0xd8] sm:$0xff] %vm2395_vm2, %v2306_v57 }
 0x33d   : > { %2397 = vst.msk [vmem:[%s4231_s23 + $0x68] sm:$0xff] %vm2395_vm2, %v2302_v48 }
 0x33e   : > { %v1632_v53 = vpop.f32.mrf.mxu2  ;;  %v1721_v58 = vpop.f32.mrf.mxu3 }
 0x33f   : > { %v3334_v11 = vpop.eup %3333  ;;  %v1633_v38 = vadd.f32 %v1632_v53, %v4660_v61  ;;  %v1722_v62 = vadd.f32 %v1721_v58, %v4662_v25 }
 0x340   : > { %v3336_v63 = vpop.eup %3335  ;;  %2184 = vst [vmem:[%s4231_s23 + $0x368] sm:$0xff] %v3334_v11 }
 0x341   : > { %2185 = vst [vmem:[%s4231_s23 + $0x370] sm:$0xff] %v3336_v63  ;;  %3339 = vtanh.f32 %v1633_v38  ;;  %v1812_v34 = vpop.f32.mrf.mxu0  ;;  %v2310_v63 = vpop.permute.xlu2 %2309 }
 0x342   : > { %v3338_v0 = vpop.eup %3337  ;;  %3341 = vtanh.f32 %v1722_v62  ;;  %v1813_v28 = vadd.f32 %v1812_v34, %v4644_v56  ;;  %2401 = vst.msk [vmem:[%s4231_s23 + $0x148] sm:$0xff] %vm2395_vm2, %v2310_v63 }
 0x343   : > { %2193 = vst.msk [vmem:[%s4231_s23 + $0x3b0] sm:$0xff] %vm2080_vm1, %v3338_v0 }
 0x344   : > { %3343 = vtanh.f32 %v1813_v28  ;;  %v2314_v28 = vpop.permute.xlu1 %2313 }
 0x345   : > { %2403 = vst.msk [vmem:[%s4231_s23 + $0x1b8] sm:$0xff] %vm2395_vm2, %v2314_v28 }
 0x346   : > { %v1634_v1 = vpop.f32.mrf.mxu2  ;;  %v1723_v2 = vpop.f32.mrf.mxu3 }
 0x347   : > { %v3340_v4 = vpop.eup %3339  ;;  %v1635_v24 = vadd.f32 %v1634_v1, %v4660_v61  ;;  %v1724_v45 = vadd.f32 %v1723_v2, %v4662_v25  ;;  %v2312_v1 = vpop.permute.xlu0 %2311 }
 0x348   : > { %v3342_v5 = vpop.eup %3341  ;;  %2191 = vst [vmem:[%s4231_s23 + $0x3a0] sm:$0xff] %v3340_v4 }
 0x349   : > { %2192 = vst [vmem:[%s4231_s23 + $0x3a8] sm:$0xff] %v3342_v5  ;;  %3345 = vtanh.f32 %v1635_v24  ;;  %v1815_v8 = vpop.f32.mrf.mxu0 }
 0x34a   : > { %v3344_v9 = vpop.eup %3343  ;;  %3347 = vtanh.f32 %v1724_v45  ;;  %v1816_v12 = vadd.f32 %v1815_v8, %v4644_v56  ;;  %2402 = vst.msk [vmem:[%s4231_s23 + $0x180] sm:$0xff] %vm2395_vm2, %v2312_v1 }
 0x34b   : > { %2200 = vst.msk [vmem:[%s4231_s23 + $0x3e8] sm:$0xff] %vm2080_vm1, %v3344_v9 }
 0x34c   : > { %3349 = vtanh.f32 %v1816_v12  ;;  %v2316_v12 = vpop.permute.xlu2 %2315 }
 0x34d   : > { %2404 = vst.msk [vmem:[%s4231_s23 + $0x1f0] sm:$0xff] %vm2395_vm2, %v2316_v12 }
 0x34e   : > { %v1637_v13 = vpop.f32.mrf.mxu2  ;;  %v1726_v52 = vpop.f32.mrf.mxu3 }
 0x34f   : > { %v3346_v14 = vpop.eup %3345  ;;  %v1638_v19 = vadd.f32 %v1637_v13, %v4660_v61  ;;  %v1727_v10 = vadd.f32 %v1726_v52, %v4662_v25 }
 0x350   : > { %v3348_v15 = vpop.eup %3347  ;;  %2198 = vst [vmem:[%s4231_s23 + $0x3d8] sm:$0xff] %v3346_v14  ;;  %v2320_v14 = vpop.permute.xlu1 %2319 }
 0x351   : > { %2199 = vst [vmem:[%s4231_s23 + $0x3e0] sm:$0xff] %v3348_v15  ;;  %3351 = vtanh.f32 %v1638_v19  ;;  %v1817_v31 = vpop.f32.mrf.mxu0  ;;  %v2318_v19 = vpop.permute.xlu0 %2317 }
 0x352   : > { %v3350_v51 = vpop.eup %3349  ;;  %3353 = vtanh.f32 %v1727_v10  ;;  %v1818_v16 = vadd.f32 %v1817_v31, %v4644_v56  ;;  %2406 = vst.msk [vmem:[%s4231_s23 + $0x260] sm:$0xff] %vm2395_vm2, %v2320_v14 }
 0x353   : > { %2207 = vst.msk [vmem:[%s4231_s23 + $0x420] sm:$0xff] %vm2080_vm1, %v3350_v51 }
 0x354   : > { %3355 = vtanh.f32 %v1818_v16  ;;  %2405 = vst.msk [vmem:[%s4231_s23 + $0x228] sm:$0xff] %vm2395_vm2, %v2318_v19 }
 0x356   : > { %v1639_v54 = vpop.f32.mrf.mxu2  ;;  %v1728_v59 = vpop.f32.mrf.mxu3 }
 0x357   : > { %v3352_v18 = vpop.eup %3351  ;;  %v1640_v17 = vadd.f32 %v1639_v54, %v4660_v61  ;;  %v1729_v20 = vadd.f32 %v1728_v59, %v4662_v25 }
 0x358   : > { %v3354_v21 = vpop.eup %3353  ;;  %2205 = vst [vmem:[%s4231_s23 + $0x410] sm:$0xff] %v3352_v18  ;;  %v2322_v18 = vpop.permute.xlu2 %2321 }
 0x359   : > { %2206 = vst [vmem:[%s4231_s23 + $0x418] sm:$0xff] %v3354_v21  ;;  %3357 = vtanh.f32 %v1640_v17  ;;  %v1820_v22 = vpop.f32.mrf.mxu0  ;;  %v2326_v21 = vpop.permute.xlu1 %2325 }
 0x35a   : > { %v3356_v23 = vpop.eup %3355  ;;  %3359 = vtanh.f32 %v1729_v20  ;;  %v1821_v26 = vadd.f32 %v1820_v22, %v4644_v56  ;;  %2407 = vst.msk [vmem:[%s4231_s23 + $0x298] sm:$0xff] %vm2395_vm2, %v2322_v18  ;;  %v2324_v22 = vpop.permute.xlu0 %2323 }
 0x35b   : > { %2214 = vst.msk [vmem:[%s4231_s23 + $0x458] sm:$0xff] %vm2080_vm1, %v3356_v23 }
 0x35c   : > { %3361 = vtanh.f32 %v1821_v26  ;;  %2409 = vst.msk [vmem:[%s4231_s23 + $0x308] sm:$0xff] %vm2395_vm2, %v2326_v21 }
 0x35d   : > { %2408 = vst.msk [vmem:[%s4231_s23 + $0x2d0] sm:$0xff] %vm2395_vm2, %v2324_v22 }
 0x35e   : > { %v1642_v60 = vpop.f32.mrf.mxu2  ;;  %v1731_v29 = vpop.f32.mrf.mxu3 }
 0x35f   : > { %v3358_v27 = vpop.eup %3357  ;;  %v1643_v55 = vadd.f32 %v1642_v60, %v4660_v61  ;;  %v1732_v33 = vadd.f32 %v1731_v29, %v4662_v25 }
 0x360   : > { %v3360_v32 = vpop.eup %3359  ;;  %2212 = vst [vmem:[%s4231_s23 + $0x448] sm:$0xff] %v3358_v27 }
 0x361   : > { %2213 = vst [vmem:[%s4231_s23 + $0x450] sm:$0xff] %v3360_v32  ;;  %3363 = vtanh.f32 %v1643_v55  ;;  %v1822_v35 = vpop.f32.mrf.mxu0  ;;  %v2328_v32 = vpop.permute.xlu2 %2327 }
 0x362   : > { %v3362_v44 = vpop.eup %3361  ;;  %3365 = vtanh.f32 %v1732_v33  ;;  %v1823_v47 = vadd.f32 %v1822_v35, %v4644_v56  ;;  %2410 = vst.msk [vmem:[%s4231_s23 + $0x340] sm:$0xff] %vm2395_vm2, %v2328_v32 }
 0x363   : > { %2221 = vst.msk [vmem:[%s4231_s23 + $0x490] sm:$0xff] %vm2080_vm1, %v3362_v44  ;;  %v2332_v44 = vpop.permute.xlu1 %2331 }
 0x364   : > { %3367 = vtanh.f32 %v1823_v47  ;;  %v2330_v47 = vpop.permute.xlu0 %2329  ;;  %2412 = vst.msk [vmem:[%s4231_s23 + $0x3b0] sm:$0xff] %vm2395_vm2, %v2332_v44 }
 0x365   : > { %2411 = vst.msk [vmem:[%s4231_s23 + $0x378] sm:$0xff] %vm2395_vm2, %v2330_v47 }
 0x366   : > { %v1644_v37 = vpop.f32.mrf.mxu2  ;;  %v1733_v39 = vpop.f32.mrf.mxu3 }
 0x367   : > { %v3364_v40 = vpop.eup %3363  ;;  %v1645_v41 = vadd.f32 %v1644_v37, %v4660_v61  ;;  %v1734_v43 = vadd.f32 %v1733_v39, %v4662_v25 }
 0x368   : > { %v3366_v42 = vpop.eup %3365  ;;  %2219 = vst [vmem:[%s4231_s23 + $0x480] sm:$0xff] %v3364_v40 }
 0x369   : > { %2220 = vst [vmem:[%s4231_s23 + $0x488] sm:$0xff] %v3366_v42  ;;  %3369 = vtanh.f32 %v1645_v41  ;;  %v1825_v3 = vpop.f32.mrf.mxu0 }
 0x36a   : > { %v3368_v30 = vpop.eup %3367  ;;  %3371 = vtanh.f32 %v1734_v43  ;;  %v1826_v7 = vadd.f32 %v1825_v3, %v4644_v56  ;;  %v2334_v3 = vpop.permute.xlu2 %2333 }
 0x36b   : > { %2228 = vst.msk [vmem:[%s4231_s23 + $0x4c8] sm:$0xff] %vm2080_vm1, %v3368_v30 }
 0x36c   : > { %3373 = vtanh.f32 %v1826_v7  ;;  %2413 = vst.msk [vmem:[%s4231_s23 + $0x3e8] sm:$0xff] %vm2395_vm2, %v2334_v3  ;;  %v2338_v7 = vpop.permute.xlu1 %2337  ;;  %v2336_v57 = vpop.permute.xlu0 %2335 }
 0x36d   : > { %2415 = vst.msk [vmem:[%s4231_s23 + $0x458] sm:$0xff] %vm2395_vm2, %v2338_v7 }
 0x36e   : > { %v1647_v49 = vpop.f32.mrf.mxu2  ;;  %v1736_v50 = vpop.f32.mrf.mxu3  ;;  %2414 = vst.msk [vmem:[%s4231_s23 + $0x420] sm:$0xff] %vm2395_vm2, %v2336_v57 }
 0x36f   : > { %v3370_v53 = vpop.eup %3369  ;;  %v1648_v58 = vadd.f32 %v1647_v49, %v4660_v61  ;;  %v1737_v11 = vadd.f32 %v1736_v50, %v4662_v25 }
 0x370   : > { %v3372_v38 = vpop.eup %3371  ;;  %2226 = vst [vmem:[%s4231_s23 + $0x4b8] sm:$0xff] %v3370_v53 }
 0x371   : > { %2227 = vst [vmem:[%s4231_s23 + $0x4c0] sm:$0xff] %v3372_v38  ;;  %3375 = vtanh.f32 %v1648_v58  ;;  %v1827_v62 = vpop.f32.mrf.mxu0 }
 0x372   : > { %v3374_v34 = vpop.eup %3373  ;;  %3377 = vtanh.f32 %v1737_v11  ;;  %v1828_v0 = vadd.f32 %v1827_v62, %v4644_v56  ;;  %v2340_v62 = vpop.permute.xlu2 %2339 }
 0x373   : > { %2235 = vst.msk [vmem:[%s4231_s23 + $0x500] sm:$0xff] %vm2080_vm1, %v3374_v34 }
 0x374   : > { %3379 = vtanh.f32 %v1828_v0  ;;  %2416 = vst.msk [vmem:[%s4231_s23 + $0x490] sm:$0xff] %vm2395_vm2, %v2340_v62  ;;  %v2344_v0 = vpop.permute.xlu1 %2343  ;;  %v2342_v28 = vpop.permute.xlu0 %2341 }
 0x375   : > { %2418 = vst.msk [vmem:[%s4231_s23 + $0x500] sm:$0xff] %vm2395_vm2, %v2344_v0 }
 0x376   : > { %v1649_v2 = vpop.f32.mrf.mxu2  ;;  %v1738_v4 = vpop.f32.mrf.mxu3  ;;  %2417 = vst.msk [vmem:[%s4231_s23 + $0x4c8] sm:$0xff] %vm2395_vm2, %v2342_v28 }
 0x377   : > { %v3376_v24 = vpop.eup %3375  ;;  %v1650_v45 = vadd.f32 %v1649_v2, %v4660_v61  ;;  %v1739_v5 = vadd.f32 %v1738_v4, %v4662_v25 }
 0x378   : > { %v3378_v8 = vpop.eup %3377  ;;  %2233 = vst [vmem:[%s4231_s23 + $0x4f0] sm:$0xff] %v3376_v24 }
 0x379   : > { %2234 = vst [vmem:[%s4231_s23 + $0x4f8] sm:$0xff] %v3378_v8  ;;  %3381 = vtanh.f32 %v1650_v45  ;;  %v1830_v9 = vpop.f32.mrf.mxu0 }
 0x37a   : > { %v3380_v13 = vpop.eup %3379  ;;  %3383 = vtanh.f32 %v1739_v5  ;;  %v1831_v52 = vadd.f32 %v1830_v9, %v4644_v56  ;;  %v2346_v9 = vpop.permute.xlu2 %2345 }
 0x37b   : > { %2242 = vst.msk [vmem:[%s4231_s23 + $0x538] sm:$0xff] %vm2080_vm1, %v3380_v13 }
 0x37c   : > { %3385 = vtanh.f32 %v1831_v52  ;;  %2419 = vst.msk [vmem:[%s4231_s23 + $0x538] sm:$0xff] %vm2395_vm2, %v2346_v9  ;;  %v2350_v52 = vpop.permute.xlu1 %2349  ;;  %v2348_v14 = vpop.permute.xlu0 %2347 }
 0x37e   : > { %v1652_v10 = vpop.f32.mrf.mxu2  ;;  %v1741_v15 = vpop.f32.mrf.mxu3 }
 0x37f   : > { %v3382_v31 = vpop.eup %3381  ;;  %v1653_v51 = vadd.f32 %v1652_v10, %v4660_v61  ;;  %v1742_v16 = vadd.f32 %v1741_v15, %v4662_v25 }
 0x380   : > { %v3384_v54 = vpop.eup %3383  ;;  %2240 = vst [vmem:[%s4231_s23 + $0x528] sm:$0xff] %v3382_v31 }
 0x381   : > { %2241 = vst [vmem:[%s4231_s23 + $0x530] sm:$0xff] %v3384_v54  ;;  %3387 = vtanh.f32 %v1653_v51  ;;  %v1832_v59 = vpop.f32.mrf.mxu0 }
 0x382   : > { %v3386_v17 = vpop.eup %3385  ;;  %3389 = vtanh.f32 %v1742_v16  ;;  %v1833_v20 = vadd.f32 %v1832_v59, %v4644_v56  ;;  %v2352_v54 = vpop.permute.xlu2 %2351 }
 0x383   : > { %2249 = vst.msk [vmem:[%s4231_s23 + $0x570] sm:$0xff] %vm2080_vm1, %v3386_v17 }
 0x384   : > { %3391 = vtanh.f32 %v1833_v20  ;;  %2420 = vst.msk [vmem:[%s4231_s23 + $0x570] sm:$0xff] %vm2395_vm2, %v2348_v14  ;;  %v2356_v18 = vpop.permute.xlu1 %2355  ;;  %v2354_v17 = vpop.permute.xlu0 %2353 }
 0x386   : > { %v1654_v23 = vpop.f32.mrf.mxu2  ;;  %v1743_v26 = vpop.f32.mrf.mxu3 }
 0x387   : > { %v3388_v60 = vpop.eup %3387  ;;  %v1655_v29 = vadd.f32 %v1654_v23, %v4660_v61  ;;  %v1744_v27 = vadd.f32 %v1743_v26, %v4662_v25 }
 0x388   : > { %v3390_v55 = vpop.eup %3389  ;;  %2247 = vst [vmem:[%s4231_s23 + $0x560] sm:$0xff] %v3388_v60 }
 0x389   : > { %2248 = vst [vmem:[%s4231_s23 + $0x568] sm:$0xff] %v3390_v55  ;;  %3393 = vtanh.f32 %v1655_v29  ;;  %v1835_v33 = vpop.f32.mrf.mxu0 }
 0x38a   : > { %v3392_v35 = vpop.eup %3391  ;;  %3395 = vtanh.f32 %v1744_v27  ;;  %v1836_v36 = vadd.f32 %v1835_v33, %v4644_v56  ;;  %v2358_v29 = vpop.permute.xlu2 %2357 }
 0x38b   : > { %2256 = vst.msk [vmem:[%s4231_s23 + $0x5a8] sm:$0xff] %vm2080_vm1, %v3392_v35 }
 0x38c   : > { %3397 = vtanh.f32 %v1836_v36  ;;  %2421 = vst.msk [vmem:[%s4231_s23 + $0x5a8] sm:$0xff] %vm2395_vm2, %v2350_v52 }
 0x38e   : > { %v1657_v6 = vpop.f32.mrf.mxu2  ;;  %v1746_v37 = vpop.f32.mrf.mxu3 }
 0x38f   : > { %v3394_v39 = vpop.eup %3393  ;;  %v1658_v40 = vadd.f32 %v1657_v6, %v4660_v61  ;;  %v1747_v41 = vadd.f32 %v1746_v37, %v4662_v25 }
 0x390   : > { %v3396_v43 = vpop.eup %3395  ;;  %2254 = vst [vmem:[%s4231_s23 + $0x598] sm:$0xff] %v3394_v39  ;;  %v2360_v39 = vpop.permute.xlu0 %2359 }
 0x391   : > { %2255 = vst [vmem:[%s4231_s23 + $0x5a0] sm:$0xff] %v3396_v43  ;;  %3399 = vtanh.f32 %v1658_v40  ;;  %v1837_v42 = vpop.f32.mrf.mxu0 }
 0x392   : > { %v3398_v46 = vpop.eup %3397  ;;  %3401 = vtanh.f32 %v1747_v41  ;;  %v1838_v30 = vadd.f32 %v1837_v42, %v4644_v56  ;;  %v2362_v41 = vpop.permute.xlu1 %2361 }
 0x393   : > { %2263 = vst.msk [vmem:[%s4231_s23 + $0x5e0] sm:$0xff] %vm2080_vm1, %v3398_v46 }
 0x394   : > { %3403 = vtanh.f32 %v1838_v30  ;;  %2422 = vst.msk [vmem:[%s4231_s23 + $0x5e0] sm:$0xff] %vm2395_vm2, %v2352_v54 }
 0x396   : > { %v1659_v48 = vpop.f32.mrf.mxu2  ;;  %v1748_v49 = vpop.f32.mrf.mxu3 }
 0x397   : > { %v3400_v50 = vpop.eup %3399  ;;  %v1660_v53 = vadd.f32 %v1659_v48, %v4660_v61  ;;  %v1749_v58 = vadd.f32 %v1748_v49, %v4662_v25 }
 0x398   : > { %v3402_v11 = vpop.eup %3401  ;;  %2261 = vst [vmem:[%s4231_s23 + $0x5d0] sm:$0xff] %v3400_v50 }
 0x399   : > { %2262 = vst [vmem:[%s4231_s23 + $0x5d8] sm:$0xff] %v3402_v11  ;;  %3405 = vtanh.f32 %v1660_v53  ;;  %v1840_v38 = vpop.f32.mrf.mxu0 }
 0x39a   : > { %v3404_v63 = vpop.eup %3403  ;;  %3407 = vtanh.f32 %v1749_v58  ;;  %v1841_v34 = vadd.f32 %v1840_v38, %v4644_v56 }
 0x39b   : > { %2270 = vst.msk [vmem:[%s4231_s23 + $0x618] sm:$0xff] %vm2080_vm1, %v3404_v63 }
 0x39c   : > { %3409 = vtanh.f32 %v1841_v34  ;;  %2423 = vst.msk [vmem:[%s4231_s23 + $0x618] sm:$0xff] %vm2395_vm2, %v2354_v17 }
 0x39e   : > { %v1662_v1 = vpop.f32.mrf.mxu2  ;;  %v1751_v2 = vpop.f32.mrf.mxu3 }
 0x39f   : > { %v3406_v4 = vpop.eup %3405  ;;  %v1663_v24 = vadd.f32 %v1662_v1, %v4660_v61  ;;  %v1752_v45 = vadd.f32 %v1751_v2, %v4662_v25 }
 0x3a0   : > { %v3408_v5 = vpop.eup %3407  ;;  %2268 = vst [vmem:[%s4231_s23 + $0x608] sm:$0xff] %v3406_v4 }
 0x3a1   : > { %2269 = vst [vmem:[%s4231_s23 + $0x610] sm:$0xff] %v3408_v5  ;;  %3411 = vtanh.f32 %v1663_v24  ;;  %v1842_v8 = vpop.f32.mrf.mxu0 }
 0x3a2   : > { %v3410_v12 = vpop.eup %3409  ;;  %3413 = vtanh.f32 %v1752_v45  ;;  %v1843_v13 = vadd.f32 %v1842_v8, %v4644_v56 }
 0x3a3   : > { %2277 = vst.msk [vmem:[%s4231_s23 + $0x650] sm:$0xff] %vm2080_vm1, %v3410_v12 }
 0x3a4   : > { %3415 = vtanh.f32 %v1843_v13  ;;  %2424 = vst.msk [vmem:[%s4231_s23 + $0x650] sm:$0xff] %vm2395_vm2, %v2356_v18 }
 0x3a6   : > { %v1664_v19 = vpop.f32.mrf.mxu2  ;;  %v1753_v10 = vpop.f32.mrf.mxu3 }
 0x3a7   : > { %v3412_v15 = vpop.eup %3411  ;;  %v1665_v31 = vadd.f32 %v1664_v19, %v4660_v61  ;;  %v1754_v51 = vadd.f32 %v1753_v10, %v4662_v25 }
 0x3a8   : > { %v3414_v16 = vpop.eup %3413  ;;  %2275 = vst [vmem:[%s4231_s23 + $0x640] sm:$0xff] %v3412_v15 }
 0x3a9   : > { %2276 = vst [vmem:[%s4231_s23 + $0x648] sm:$0xff] %v3414_v16  ;;  %3417 = vtanh.f32 %v1665_v31 }
 0x3aa   : > { %v3416_v59 = vpop.eup %3415  ;;  %3419 = vtanh.f32 %v1754_v51 }
 0x3ab   : > { %2284 = vst.msk [vmem:[%s4231_s23 + $0x688] sm:$0xff] %vm2080_vm1, %v3416_v59 }
 0x3ac   : > { %2425 = vst.msk [vmem:[%s4231_s23 + $0x688] sm:$0xff] %vm2395_vm2, %v2358_v29 }
 0x3ae   : > { %v1667_v20 = vpop.f32.mrf.mxu2  ;;  %v1756_v21 = vpop.f32.mrf.mxu3 }
 0x3af   : > { %v3418_v22 = vpop.eup %3417  ;;  %v1668_v23 = vadd.f32 %v1667_v20, %v4660_v61  ;;  %v1757_v26 = vadd.f32 %v1756_v21, %v4662_v25 }
 0x3b0   : > { %v3420_v60 = vpop.eup %3419  ;;  %2282 = vst [vmem:[%s4231_s23 + $0x678] sm:$0xff] %v3418_v22 }
 0x3b1   : > { %2283 = vst [vmem:[%s4231_s23 + $0x680] sm:$0xff] %v3420_v60  ;;  %3421 = vtanh.f32 %v1668_v23 }
 0x3b2   : > { %3423 = vtanh.f32 %v1757_v26 }
 0x3b6   : > { %v1669_v27 = vpop.f32.mrf.mxu2  ;;  %v1758_v55 = vpop.f32.mrf.mxu3 }
 0x3b7   : > { %v3422_v33 = vpop.eup %3421  ;;  %v1670_v32 = vadd.f32 %v1669_v27, %v4660_v61  ;;  %v1759_v35 = vadd.f32 %v1758_v55, %v4662_v25 }
 0x3b8   : > { %v3424_v36 = vpop.eup %3423  ;;  %2289 = vst [vmem:[%s4231_s23 + $0x6b0] sm:$0xff] %v3422_v33 }
 0x3b9   : > { %2290 = vst [vmem:[%s4231_s23 + $0x6b8] sm:$0xff] %v3424_v36  ;;  %3425 = vtanh.f32 %v1670_v32 }
 0x3ba   : > { %3427 = vtanh.f32 %v1759_v35 }
 0x3be   : > { %v1845_v44 = vpop.f32.mrf.mxu3 }
 0x3bf   : > { %v3426_v47 = vpop.eup %3425  ;;  %v1846_v6 = vadd.f32 %v1845_v44, %v4644_v56 }
 0x3c0   : > { %v3428_v37 = vpop.eup %3427  ;;  %2296 = vst [vmem:[%s4231_s23 + $0x6e8] sm:$0xff] %v3426_v47 }
 0x3c1   : > { %2297 = vst [vmem:[%s4231_s23 + $0x6f0] sm:$0xff] %v3428_v37  ;;  %3429 = vtanh.f32 %v1846_v6 }
 0x3c6   : > { %v1847_v61 = vpop.f32.mrf.mxu3 }
 0x3c7   : > { %v3430_v25 = vpop.eup %3429  ;;  %v1848_v40 = vadd.f32 %v1847_v61, %v4644_v56 }
 0x3c8   : > { %2291 = vst.msk [vmem:[%s4231_s23 + $0x6c0] sm:$0xff] %vm2080_vm1, %v3430_v25 }
 0x3c9   : > { %3431 = vtanh.f32 %v1848_v40  ;;  %2426 = vst.msk [vmem:[%s4231_s23 + $0x6c0] sm:$0xff] %vm2395_vm2, %v2360_v39 }
 0x3cf   : > { %v3432_v43 = vpop.eup %3431 }
 0x3d0   : > { %2298 = vst.msk [vmem:[%s4231_s23 + $0x6f8] sm:$0xff] %vm2080_vm1, %v3432_v43 }
 0x3d1   : > { %2427 = vst.msk [vmem:[%s4231_s23 + $0x6f8] sm:$0xff] %vm2395_vm2, %v2362_v41 }
 0x3d2 PF: > { %s20_s24 = sadd.s32 1, %s3635_s24  }
 0x3d3   : > { %p17_p7 = scmp.ge.s32.totalorder %s20_s24, 4  }
 0x3d5   :  { %19 = sbr.rel (!%p17_p7) target bundleno = 3 (0x3), region = 99 }
 0x3da   :  { %2452 = vsyncpa [#allocation3], 1 }
 0x3db   :  { %2454 = vsyncpa [#allocation3 + $0x1], 1 }
 0x3dc   :  { %2455 = vsyncpa [#allocation5], 1 }
 0x3dd   :  { %2456 = vsyncpa [#allocation8], 1 }

</bundles_post_ra>
